<compile_context>
chip_gen: v5e
topology: v5e:2x2
jax: 0.10.0
libtpu: 0.0.40
codegen_flags: <defaults>
</compile_context>

<pallas_src>
import math
import jax
import jax.numpy as jnp
from jax.experimental import pallas as pl
from jax.experimental.pallas import tpu as pltpu

# ---------------- model hyperparameters (small, synthetic) ----------------
BS = 2          # batch
TQ = 8          # target (decoder) sequence length
TS = 12         # source (encoder) sequence length
HID = 32        # hidden_size
INTER = 64      # intermediate_size
NHEAD = 4       # n_head
HEAD_DIM = HID // NHEAD
LN_EPS = 1e-5
NEG = -1e9


# ---------------- the Pallas kernel (whole decoder block, whole batch) -----
def decoder_block_kernel(x_ref, smask_ref, enc_ref, cmask_ref,
                         w_attn_ref, w_ffn_ref, bias_ref, out_ref):
    x = x_ref[...]            # (BS*TQ, HID)
    smask = smask_ref[...]    # (BS*TQ, BS*TQ)  block-diag additive mask
    enc = enc_ref[...]        # (BS*TS, HID)
    cmask = cmask_ref[...]    # (BS*TQ, BS*TS)  block-diag additive mask
    W = w_attn_ref[...]       # (HID, 8*HID)
    Wf = w_ffn_ref[...]       # (HID+INTER, INTER)
    B = bias_ref[...]         # (8, 128)

    def softmax_last(s):
        m = jnp.max(s, axis=-1, keepdims=True)
        e = jnp.exp(s - m)
        # divide moved to the (otherwise idle) EUP via reciprocal
        return e * pl.reciprocal(jnp.sum(e, axis=-1, keepdims=True), approx=True)

    def layernorm(v, g, b):
        mu = jnp.mean(v, axis=-1, keepdims=True)
        var = jnp.mean((v - mu) ** 2, axis=-1, keepdims=True)
        return (v - mu) * jax.lax.rsqrt(var + LN_EPS) * g + b

    def heads_attn(q, k, v, mask, wo, bo):
        # q: (M, HID) pre-scaled; k, v: (N, HID); mask: (M, N) additive.
        # Accumulate ctx_h @ wo[h] per head -> no lane-concat relayout.
        out = jnp.broadcast_to(bo, (q.shape[0], HID))   # hoisted broadcast
        for h in range(NHEAD):                           # static unroll, NHEAD=4
            sl = slice(h * HEAD_DIM, (h + 1) * HEAD_DIM)
            s = jnp.einsum("md,nd->mn", q[:, sl], k[:, sl],
                           preferred_element_type=jnp.float32) + mask
            p = softmax_last(s)
            ctx = jnp.dot(p, v[:, sl], preferred_element_type=jnp.float32)
            out = out + jnp.dot(ctx, wo[sl, :], preferred_element_type=jnp.float32)
        return out

    # ---- self-attention (fused QKV projection) + residual + LN1 ----
    qkv = jnp.dot(x, W[:, 0:3 * HID],
                  preferred_element_type=jnp.float32) + B[0:1, 0:3 * HID]
    attn = heads_attn(qkv[:, 0:HID], qkv[:, HID:2 * HID], qkv[:, 2 * HID:3 * HID],
                      smask, W[:, 3 * HID:4 * HID], B[1:2, 0:HID])
    h = layernorm(attn + x, B[6:7, 0:HID], B[7:8, 0:HID])

    # ---- cross-attention (fused KV projection on encoder) + residual + LN2 ----
    qc = jnp.dot(h, W[:, 4 * HID:5 * HID],
                 preferred_element_type=jnp.float32) + B[2:3, 0:HID]
    kvc = jnp.dot(enc, W[:, 5 * HID:7 * HID],
                  preferred_element_type=jnp.float32) + B[2:3, HID:3 * HID]
    cattn = heads_attn(qc, kvc[:, 0:HID], kvc[:, HID:2 * HID],
                       cmask, W[:, 7 * HID:8 * HID], B[3:4, 0:HID])
    h2 = layernorm(cattn + h, B[6:7, HID:2 * HID], B[7:8, HID:2 * HID])

    # ---- feed-forward + residual + LN3 ----
    ff = jnp.maximum(
        jnp.dot(h2, Wf[0:HID, :], preferred_element_type=jnp.float32)
        + B[4:5, 0:INTER], 0.0)
    ff = jnp.dot(ff, Wf[HID:HID + INTER, 0:HID],
                 preferred_element_type=jnp.float32) + B[5:6, 0:HID]
    out_ref[...] = layernorm(ff + h2,
                             B[6:7, 2 * HID:3 * HID], B[7:8, 2 * HID:3 * HID])


# ---------------- wrapper (host-side layout plumbing + pallas_call) --------
def _block_diag_mask(mask4d, bs, q_len, k_len):
    """(bs, 1, q_len or 1, k_len) additive mask -> (bs*q_len, bs*k_len) block-diag."""
    m = jnp.broadcast_to(mask4d[:, 0].astype(jnp.float32), (bs, q_len, k_len))
    neg = jnp.full((q_len, k_len), NEG, jnp.float32)
    rows = []
    for b in range(bs):
        rows.append(jnp.concatenate(
            [m[b] if bb == b else neg for bb in range(bs)], axis=1))
    return jnp.concatenate(rows, axis=0)


def decoder_block_pallas(hs, attention_mask, enc_hs, enc_attention_mask, params):
    bs, tq, hid = hs.shape
    ts = enc_hs.shape[1]
    assert hid == HID and tq == TQ and ts == TS

    (wq, bq, wk, bk, wv, bv, wo, bo, g1, be1,
     cwq, cbq, cwk, cbk, cwv, cbv, cwo, cbo, g2, be2,
     w1, b1, w2, b2, g3, be3) = params

    scale = 1.0 / math.sqrt(HEAD_DIM)

    # pack 26 parameters into 3 slabs; bake the 1/sqrt(head_dim) scale into Wq/bq
    w_attn = jnp.concatenate(
        [wq * scale, wk, wv, wo, cwq * scale, cwk, cwv, cwo], axis=1)   # (HID, 8*HID)
    w_ffn = jnp.concatenate(
        [w1, jnp.pad(w2, ((0, 0), (0, INTER - hid)))], axis=0)          # (HID+INTER, INTER)

    def row(*pieces, width=128):
        v = jnp.concatenate([jnp.reshape(p, (-1,)) for p in pieces]).astype(jnp.float32)
        return jnp.pad(v, (0, width - v.shape[0]))

    bias_slab = jnp.stack([
        row(bq * scale, bk, bv),      # 0: self fused qkv bias (q pre-scaled)
        row(bo),                      # 1: self out bias
        row(cbq * scale, cbk, cbv),   # 2: cross fused qkv bias
        row(cbo),                     # 3: cross out bias
        row(b1),                      # 4: ffn bias 1 (width INTER)
        row(b2),                      # 5: ffn bias 2
        row(g1, g2, g3),              # 6: LN gammas
        row(be1, be2, be3),           # 7: LN betas
    ])                                # (8, 128)

    # fold batch into rows; masks become block-diagonal additive masks
    x2 = hs.reshape(bs * tq, hid)
    enc2 = enc_hs.reshape(bs * ts, hid)
    smask = _block_diag_mask(attention_mask, bs, tq, tq)        # (bs*tq, bs*tq)
    cmask = _block_diag_mask(enc_attention_mask, bs, tq, ts)    # (bs*tq, bs*ts)

    vmem = pl.BlockSpec(memory_space=pltpu.MemorySpace.VMEM)
    out_flat = pl.pallas_call(
        decoder_block_kernel,
        out_shape=jax.ShapeDtypeStruct((bs * tq, hid), jnp.float32),
        in_specs=[vmem] * 7,
        out_specs=vmem,
    )(x2, smask, enc2, cmask, w_attn, w_ffn, bias_slab)
    # NOTE: output kept in its natural (rows, HID) layout; widening the store to
    # >=128 lanes would need an in-kernel lane relayout that costs more than the
    # couple of masked stores it saves at HID=32.
    return out_flat.reshape(bs, tq, hid)


# ---------------- pure-JAX reference (for sanity check) ----------------
def _ref_ln(x, g, b):
    mu = jnp.mean(x, axis=-1, keepdims=True)
    var = jnp.mean((x - mu) ** 2, axis=-1, keepdims=True)
    return (x - mu) / jnp.sqrt(var + LN_EPS) * g + b


def _ref_mha(xq, xkv, mask, wq, bq, wk, bk, wv, bv, wo, bo):
    bs, tq, hid = xq.shape
    tk = xkv.shape[1]
    q = (xq @ wq + bq).reshape(bs, tq, NHEAD, HEAD_DIM).transpose(0, 2, 1, 3)
    k = (xkv @ wk + bk).reshape(bs, tk, NHEAD, HEAD_DIM).transpose(0, 2, 1, 3)
    v = (xkv @ wv + bv).reshape(bs, tk, NHEAD, HEAD_DIM).transpose(0, 2, 1, 3)
    s = jnp.einsum("bhqd,bhkd->bhqk", q, k) / math.sqrt(HEAD_DIM) + mask
    p = jax.nn.softmax(s, axis=-1)
    ctx = jnp.einsum("bhqk,bhkd->bhqd", p, v).transpose(0, 2, 1, 3)
    ctx = ctx.reshape(bs, tq, hid)
    return ctx @ wo + bo


def decoder_block_ref(hs, mask, enc, emask, params):
    (wq, bq, wk, bk, wv, bv, wo, bo, g1, be1,
     cwq, cbq, cwk, cbk, cwv, cbv, cwo, cbo, g2, be2,
     w1, b1, w2, b2, g3, be3) = params
    attn = _ref_mha(hs, hs, mask, wq, bq, wk, bk, wv, bv, wo, bo)
    h = _ref_ln(attn + hs, g1, be1)
    cattn = _ref_mha(h, enc, emask, cwq, cbq, cwk, cbk, cwv, cbv, cwo, cbo)
    h2 = _ref_ln(cattn + h, g2, be2)
    ff = jnp.maximum(h2 @ w1 + b1, 0.0) @ w2 + b2
    return _ref_ln(ff + h2, g3, be3)


# ---------------- deterministic parameter construction ----------------
def make_params(key):
    keys = jax.random.split(key, 16)

    def lin(k, din, dout):
        kw, kb = jax.random.split(k)
        w = 0.05 * jax.random.normal(kw, (din, dout), jnp.float32)
        b = 0.05 * jax.random.normal(kb, (1, dout), jnp.float32)
        return w, b

    wq, bq = lin(keys[0], HID, HID)
    wk, bk = lin(keys[1], HID, HID)
    wv, bv = lin(keys[2], HID, HID)
    wo, bo = lin(keys[3], HID, HID)
    g1, be1 = jnp.ones((1, HID), jnp.float32), jnp.zeros((1, HID), jnp.float32)
    cwq, cbq = lin(keys[4], HID, HID)
    cwk, cbk = lin(keys[5], HID, HID)
    cwv, cbv = lin(keys[6], HID, HID)
    cwo, cbo = lin(keys[7], HID, HID)
    g2, be2 = jnp.ones((1, HID), jnp.float32), jnp.zeros((1, HID), jnp.float32)
    w1, b1 = lin(keys[8], HID, INTER)
    w2, b2 = lin(keys[9], INTER, HID)
    g3, be3 = jnp.ones((1, HID), jnp.float32), jnp.zeros((1, HID), jnp.float32)
    return (wq, bq, wk, bk, wv, bv, wo, bo, g1, be1,
            cwq, cbq, cwk, cbk, cwv, cbv, cwo, cbo, g2, be2,
            w1, b1, w2, b2, g3, be3)


if __name__ == "__main__":
    key = jax.random.PRNGKey(0)
    k_hs, k_enc, k_par = jax.random.split(key, 3)

    hidden_states = jax.random.normal(k_hs, (BS, TQ, HID), jnp.float32)
    encoder_hidden_states = jax.random.normal(k_enc, (BS, TS, HID), jnp.float32)

    # causal decoder self-attention mask: 0 where allowed, -1e9 where masked
    causal = jnp.tril(jnp.ones((TQ, TQ), jnp.float32))
    attention_mask = jnp.where(causal[None, None] > 0, 0.0, -1e9)
    attention_mask = jnp.broadcast_to(attention_mask, (BS, 1, TQ, TQ))

    # encoder (key) padding mask: mask out last 3 source positions of batch 1
    emask = jnp.zeros((BS, 1, 1, TS), jnp.float32)
    emask = emask.at[1, 0, 0, TS - 3:].set(-1e9)

    params = make_params(k_par)

    out = decoder_block_pallas(hidden_states, attention_mask,
                               encoder_hidden_states, emask, params)
    out = jax.block_until_ready(out)

    ref = decoder_block_ref(hidden_states, attention_mask,
                            encoder_hidden_states, emask, params)
    assert out.shape == (BS, TQ, HID)
    assert jnp.allclose(out, ref, rtol=1e-2, atol=1e-2), "mismatch vs reference"

    print("KERNEL_OK")
</pallas_src>

<mosaic_0001>
module attributes {stable_mosaic.version = 11 : i64} {
  func.func @decoder_block_kernel(%arg0: memref<16x32xf32, #tpu.memory_space<vmem>>, %arg1: memref<16x16xf32, #tpu.memory_space<vmem>>, %arg2: memref<24x32xf32, #tpu.memory_space<vmem>>, %arg3: memref<16x24xf32, #tpu.memory_space<vmem>>, %arg4: memref<32x256xf32, #tpu.memory_space<vmem>>, %arg5: memref<96x64xf32, #tpu.memory_space<vmem>>, %arg6: memref<8x128xf32, #tpu.memory_space<vmem>>, %arg7: memref<16x32xf32, #tpu.memory_space<vmem>>) attributes {dimension_semantics = [], scalar_prefetch = 0 : i64, scratch_operands = 0 : i64, tpu.core_type = #tpu.core_type<tc>} {
    %c0 = arith.constant 0 : index
    %c0_0 = arith.constant 0 : index
    %0 = vector.load %arg0[%c0, %c0_0] : memref<16x32xf32, #tpu.memory_space<vmem>>, vector<16x32xf32>
    %c0_1 = arith.constant 0 : index
    %c0_2 = arith.constant 0 : index
    %1 = vector.load %arg1[%c0_1, %c0_2] : memref<16x16xf32, #tpu.memory_space<vmem>>, vector<16x16xf32>
    %c0_3 = arith.constant 0 : index
    %c0_4 = arith.constant 0 : index
    %2 = vector.load %arg2[%c0_3, %c0_4] : memref<24x32xf32, #tpu.memory_space<vmem>>, vector<24x32xf32>
    %c0_5 = arith.constant 0 : index
    %c0_6 = arith.constant 0 : index
    %3 = vector.load %arg3[%c0_5, %c0_6] : memref<16x24xf32, #tpu.memory_space<vmem>>, vector<16x24xf32>
    %c0_7 = arith.constant 0 : index
    %c0_8 = arith.constant 0 : index
    %4 = vector.load %arg4[%c0_7, %c0_8] : memref<32x256xf32, #tpu.memory_space<vmem>>, vector<32x256xf32>
    %c0_9 = arith.constant 0 : index
    %c0_10 = arith.constant 0 : index
    %5 = vector.load %arg5[%c0_9, %c0_10] : memref<96x64xf32, #tpu.memory_space<vmem>>, vector<96x64xf32>
    %c0_11 = arith.constant 0 : index
    %c0_12 = arith.constant 0 : index
    %6 = vector.load %arg6[%c0_11, %c0_12] : memref<8x128xf32, #tpu.memory_space<vmem>>, vector<8x128xf32>
    %7 = vector.extract_strided_slice %4 {offsets = [0, 0], sizes = [32, 96], strides = [1, 1]} : vector<32x256xf32> to vector<32x96xf32>
    %cst = arith.constant dense<0.000000e+00> : vector<16x96xf32>
    %8 = tpu.matmul %0, %7, %cst {dimension_numbers = #tpu.dot_dimension_numbers<[1], [0], [0], [1], [0, 0, 1, 1], [], []>} : vector<16x32xf32>, vector<32x96xf32>, vector<16x96xf32> -> vector<16x96xf32>
    %9 = vector.extract_strided_slice %6 {offsets = [0, 0], sizes = [1, 96], strides = [1, 1]} : vector<8x128xf32> to vector<1x96xf32>
    %10 = vector.broadcast %9 : vector<1x96xf32> to vector<16x96xf32>
    %11 = arith.addf %8, %10 : vector<16x96xf32>
    %12 = vector.extract_strided_slice %11 {offsets = [0, 0], sizes = [16, 32], strides = [1, 1]} : vector<16x96xf32> to vector<16x32xf32>
    %13 = vector.extract_strided_slice %11 {offsets = [0, 32], sizes = [16, 32], strides = [1, 1]} : vector<16x96xf32> to vector<16x32xf32>
    %14 = vector.extract_strided_slice %11 {offsets = [0, 64], sizes = [16, 32], strides = [1, 1]} : vector<16x96xf32> to vector<16x32xf32>
    %15 = vector.extract_strided_slice %4 {offsets = [0, 96], sizes = [32, 32], strides = [1, 1]} : vector<32x256xf32> to vector<32x32xf32>
    %16 = vector.extract_strided_slice %6 {offsets = [1, 0], sizes = [1, 32], strides = [1, 1]} : vector<8x128xf32> to vector<1x32xf32>
    %17 = vector.shape_cast %16 : vector<1x32xf32> to vector<1x32xf32>
    %18 = vector.broadcast %17 : vector<1x32xf32> to vector<16x32xf32>
    %19 = vector.extract_strided_slice %12 {offsets = [0, 0], sizes = [16, 8], strides = [1, 1]} : vector<16x32xf32> to vector<16x8xf32>
    %20 = vector.extract_strided_slice %13 {offsets = [0, 0], sizes = [16, 8], strides = [1, 1]} : vector<16x32xf32> to vector<16x8xf32>
    "tpu.trace_start"() <{level = 10 : i32, message = "md,nd->mn"}> : () -> ()
    %cst_13 = arith.constant dense<0.000000e+00> : vector<16x16xf32>
    %21 = tpu.matmul %19, %20, %cst_13 {dimension_numbers = #tpu.dot_dimension_numbers<[1], [1], [0], [0], [0, 0, 1, 0], [], []>} : vector<16x8xf32>, vector<16x8xf32>, vector<16x16xf32> -> vector<16x16xf32>
    "tpu.trace_stop"() : () -> ()
    %22 = arith.addf %21, %1 : vector<16x16xf32>
    %cst_14 = arith.constant dense<0xFF800000> : vector<16xf32>
    %23 = vector.multi_reduction <maximumf>, %22, %cst_14 [1] : vector<16x16xf32> to vector<16xf32>
    %24 = vector.shape_cast %23 : vector<16xf32> to vector<16x1xf32>
    %25 = vector.broadcast %24 : vector<16x1xf32> to vector<16x16xf32>
    %26 = arith.subf %22, %25 : vector<16x16xf32>
    %27 = math.exp %26 : vector<16x16xf32>
    %cst_15 = arith.constant dense<0.000000e+00> : vector<16xf32>
    %28 = vector.multi_reduction <add>, %27, %cst_15 [1] : vector<16x16xf32> to vector<16xf32>
    %29 = vector.shape_cast %28 : vector<16xf32> to vector<16x1xf32>
    %30 = tpu.reciprocal %29 {approx = true} : vector<16x1xf32> -> vector<16x1xf32>
    %31 = vector.broadcast %30 : vector<16x1xf32> to vector<16x16xf32>
    %32 = arith.mulf %27, %31 : vector<16x16xf32>
    %33 = vector.extract_strided_slice %14 {offsets = [0, 0], sizes = [16, 8], strides = [1, 1]} : vector<16x32xf32> to vector<16x8xf32>
    %cst_16 = arith.constant dense<0.000000e+00> : vector<16x8xf32>
    %34 = tpu.matmul %32, %33, %cst_16 {dimension_numbers = #tpu.dot_dimension_numbers<[1], [0], [0], [1], [0, 0, 1, 1], [], []>} : vector<16x16xf32>, vector<16x8xf32>, vector<16x8xf32> -> vector<16x8xf32>
    %35 = vector.extract_strided_slice %15 {offsets = [0, 0], sizes = [8, 32], strides = [1, 1]} : vector<32x32xf32> to vector<8x32xf32>
    %cst_17 = arith.constant dense<0.000000e+00> : vector<16x32xf32>
    %36 = tpu.matmul %34, %35, %cst_17 {dimension_numbers = #tpu.dot_dimension_numbers<[1], [0], [0], [1], [0, 0, 1, 1], [], []>} : vector<16x8xf32>, vector<8x32xf32>, vector<16x32xf32> -> vector<16x32xf32>
    %37 = arith.addf %18, %36 : vector<16x32xf32>
    %38 = vector.extract_strided_slice %12 {offsets = [0, 8], sizes = [16, 8], strides = [1, 1]} : vector<16x32xf32> to vector<16x8xf32>
    %39 = vector.extract_strided_slice %13 {offsets = [0, 8], sizes = [16, 8], strides = [1, 1]} : vector<16x32xf32> to vector<16x8xf32>
    "tpu.trace_start"() <{level = 10 : i32, message = "md,nd->mn"}> : () -> ()
    %cst_18 = arith.constant dense<0.000000e+00> : vector<16x16xf32>
    %40 = tpu.matmul %38, %39, %cst_18 {dimension_numbers = #tpu.dot_dimension_numbers<[1], [1], [0], [0], [0, 0, 1, 0], [], []>} : vector<16x8xf32>, vector<16x8xf32>, vector<16x16xf32> -> vector<16x16xf32>
    "tpu.trace_stop"() : () -> ()
    %41 = arith.addf %40, %1 : vector<16x16xf32>
    %cst_19 = arith.constant dense<0xFF800000> : vector<16xf32>
    %42 = vector.multi_reduction <maximumf>, %41, %cst_19 [1] : vector<16x16xf32> to vector<16xf32>
    %43 = vector.shape_cast %42 : vector<16xf32> to vector<16x1xf32>
    %44 = vector.broadcast %43 : vector<16x1xf32> to vector<16x16xf32>
    %45 = arith.subf %41, %44 : vector<16x16xf32>
    %46 = math.exp %45 : vector<16x16xf32>
    %cst_20 = arith.constant dense<0.000000e+00> : vector<16xf32>
    %47 = vector.multi_reduction <add>, %46, %cst_20 [1] : vector<16x16xf32> to vector<16xf32>
    %48 = vector.shape_cast %47 : vector<16xf32> to vector<16x1xf32>
    %49 = tpu.reciprocal %48 {approx = true} : vector<16x1xf32> -> vector<16x1xf32>
    %50 = vector.broadcast %49 : vector<16x1xf32> to vector<16x16xf32>
    %51 = arith.mulf %46, %50 : vector<16x16xf32>
    %52 = vector.extract_strided_slice %14 {offsets = [0, 8], sizes = [16, 8], strides = [1, 1]} : vector<16x32xf32> to vector<16x8xf32>
    %cst_21 = arith.constant dense<0.000000e+00> : vector<16x8xf32>
    %53 = tpu.matmul %51, %52, %cst_21 {dimension_numbers = #tpu.dot_dimension_numbers<[1], [0], [0], [1], [0, 0, 1, 1], [], []>} : vector<16x16xf32>, vector<16x8xf32>, vector<16x8xf32> -> vector<16x8xf32>
    %54 = vector.extract_strided_slice %15 {offsets = [8, 0], sizes = [8, 32], strides = [1, 1]} : vector<32x32xf32> to vector<8x32xf32>
    %cst_22 = arith.constant dense<0.000000e+00> : vector<16x32xf32>
    %55 = tpu.matmul %53, %54, %cst_22 {dimension_numbers = #tpu.dot_dimension_numbers<[1], [0], [0], [1], [0, 0, 1, 1], [], []>} : vector<16x8xf32>, vector<8x32xf32>, vector<16x32xf32> -> vector<16x32xf32>
    %56 = arith.addf %37, %55 : vector<16x32xf32>
    %57 = vector.extract_strided_slice %12 {offsets = [0, 16], sizes = [16, 8], strides = [1, 1]} : vector<16x32xf32> to vector<16x8xf32>
    %58 = vector.extract_strided_slice %13 {offsets = [0, 16], sizes = [16, 8], strides = [1, 1]} : vector<16x32xf32> to vector<16x8xf32>
    "tpu.trace_start"() <{level = 10 : i32, message = "md,nd->mn"}> : () -> ()
    %cst_23 = arith.constant dense<0.000000e+00> : vector<16x16xf32>
    %59 = tpu.matmul %57, %58, %cst_23 {dimension_numbers = #tpu.dot_dimension_numbers<[1], [1], [0], [0], [0, 0, 1, 0], [], []>} : vector<16x8xf32>, vector<16x8xf32>, vector<16x16xf32> -> vector<16x16xf32>
    "tpu.trace_stop"() : () -> ()
    %60 = arith.addf %59, %1 : vector<16x16xf32>
    %cst_24 = arith.constant dense<0xFF800000> : vector<16xf32>
    %61 = vector.multi_reduction <maximumf>, %60, %cst_24 [1] : vector<16x16xf32> to vector<16xf32>
    %62 = vector.shape_cast %61 : vector<16xf32> to vector<16x1xf32>
    %63 = vector.broadcast %62 : vector<16x1xf32> to vector<16x16xf32>
    %64 = arith.subf %60, %63 : vector<16x16xf32>
    %65 = math.exp %64 : vector<16x16xf32>
    %cst_25 = arith.constant dense<0.000000e+00> : vector<16xf32>
    %66 = vector.multi_reduction <add>, %65, %cst_25 [1] : vector<16x16xf32> to vector<16xf32>
    %67 = vector.shape_cast %66 : vector<16xf32> to vector<16x1xf32>
    %68 = tpu.reciprocal %67 {approx = true} : vector<16x1xf32> -> vector<16x1xf32>
    %69 = vector.broadcast %68 : vector<16x1xf32> to vector<16x16xf32>
    %70 = arith.mulf %65, %69 : vector<16x16xf32>
    %71 = vector.extract_strided_slice %14 {offsets = [0, 16], sizes = [16, 8], strides = [1, 1]} : vector<16x32xf32> to vector<16x8xf32>
    %cst_26 = arith.constant dense<0.000000e+00> : vector<16x8xf32>
    %72 = tpu.matmul %70, %71, %cst_26 {dimension_numbers = #tpu.dot_dimension_numbers<[1], [0], [0], [1], [0, 0, 1, 1], [], []>} : vector<16x16xf32>, vector<16x8xf32>, vector<16x8xf32> -> vector<16x8xf32>
    %73 = vector.extract_strided_slice %15 {offsets = [16, 0], sizes = [8, 32], strides = [1, 1]} : vector<32x32xf32> to vector<8x32xf32>
    %cst_27 = arith.constant dense<0.000000e+00> : vector<16x32xf32>
    %74 = tpu.matmul %72, %73, %cst_27 {dimension_numbers = #tpu.dot_dimension_numbers<[1], [0], [0], [1], [0, 0, 1, 1], [], []>} : vector<16x8xf32>, vector<8x32xf32>, vector<16x32xf32> -> vector<16x32xf32>
    %75 = arith.addf %56, %74 : vector<16x32xf32>
    %76 = vector.extract_strided_slice %12 {offsets = [0, 24], sizes = [16, 8], strides = [1, 1]} : vector<16x32xf32> to vector<16x8xf32>
    %77 = vector.extract_strided_slice %13 {offsets = [0, 24], sizes = [16, 8], strides = [1, 1]} : vector<16x32xf32> to vector<16x8xf32>
    "tpu.trace_start"() <{level = 10 : i32, message = "md,nd->mn"}> : () -> ()
    %cst_28 = arith.constant dense<0.000000e+00> : vector<16x16xf32>
    %78 = tpu.matmul %76, %77, %cst_28 {dimension_numbers = #tpu.dot_dimension_numbers<[1], [1], [0], [0], [0, 0, 1, 0], [], []>} : vector<16x8xf32>, vector<16x8xf32>, vector<16x16xf32> -> vector<16x16xf32>
    "tpu.trace_stop"() : () -> ()
    %79 = arith.addf %78, %1 : vector<16x16xf32>
    %cst_29 = arith.constant dense<0xFF800000> : vector<16xf32>
    %80 = vector.multi_reduction <maximumf>, %79, %cst_29 [1] : vector<16x16xf32> to vector<16xf32>
    %81 = vector.shape_cast %80 : vector<16xf32> to vector<16x1xf32>
    %82 = vector.broadcast %81 : vector<16x1xf32> to vector<16x16xf32>
    %83 = arith.subf %79, %82 : vector<16x16xf32>
    %84 = math.exp %83 : vector<16x16xf32>
    %cst_30 = arith.constant dense<0.000000e+00> : vector<16xf32>
    %85 = vector.multi_reduction <add>, %84, %cst_30 [1] : vector<16x16xf32> to vector<16xf32>
    %86 = vector.shape_cast %85 : vector<16xf32> to vector<16x1xf32>
    %87 = tpu.reciprocal %86 {approx = true} : vector<16x1xf32> -> vector<16x1xf32>
    %88 = vector.broadcast %87 : vector<16x1xf32> to vector<16x16xf32>
    %89 = arith.mulf %84, %88 : vector<16x16xf32>
    %90 = vector.extract_strided_slice %14 {offsets = [0, 24], sizes = [16, 8], strides = [1, 1]} : vector<16x32xf32> to vector<16x8xf32>
    %cst_31 = arith.constant dense<0.000000e+00> : vector<16x8xf32>
    %91 = tpu.matmul %89, %90, %cst_31 {dimension_numbers = #tpu.dot_dimension_numbers<[1], [0], [0], [1], [0, 0, 1, 1], [], []>} : vector<16x16xf32>, vector<16x8xf32>, vector<16x8xf32> -> vector<16x8xf32>
    %92 = vector.extract_strided_slice %15 {offsets = [24, 0], sizes = [8, 32], strides = [1, 1]} : vector<32x32xf32> to vector<8x32xf32>
    %cst_32 = arith.constant dense<0.000000e+00> : vector<16x32xf32>
    %93 = tpu.matmul %91, %92, %cst_32 {dimension_numbers = #tpu.dot_dimension_numbers<[1], [0], [0], [1], [0, 0, 1, 1], [], []>} : vector<16x8xf32>, vector<8x32xf32>, vector<16x32xf32> -> vector<16x32xf32>
    %94 = arith.addf %75, %93 : vector<16x32xf32>
    %95 = arith.addf %94, %0 : vector<16x32xf32>
    %96 = vector.extract_strided_slice %6 {offsets = [6, 0], sizes = [1, 32], strides = [1, 1]} : vector<8x128xf32> to vector<1x32xf32>
    %97 = vector.extract_strided_slice %6 {offsets = [7, 0], sizes = [1, 32], strides = [1, 1]} : vector<8x128xf32> to vector<1x32xf32>
    %cst_33 = arith.constant dense<0.000000e+00> : vector<16xf32>
    %98 = vector.multi_reduction <add>, %95, %cst_33 [1] : vector<16x32xf32> to vector<16xf32>
    %99 = vector.shape_cast %98 : vector<16xf32> to vector<16x1xf32>
    %cst_34 = arith.constant 3.200000e+01 : f32
    %100 = vector.broadcast %cst_34 : f32 to vector<16x1xf32>
    %101 = arith.divf %99, %100 : vector<16x1xf32>
    %102 = vector.broadcast %101 : vector<16x1xf32> to vector<16x32xf32>
    %103 = arith.subf %95, %102 : vector<16x32xf32>
    %104 = arith.mulf %103, %103 : vector<16x32xf32>
    %cst_35 = arith.constant dense<0.000000e+00> : vector<16xf32>
    %105 = vector.multi_reduction <add>, %104, %cst_35 [1] : vector<16x32xf32> to vector<16xf32>
    %106 = vector.shape_cast %105 : vector<16xf32> to vector<16x1xf32>
    %cst_36 = arith.constant 3.200000e+01 : f32
    %107 = vector.broadcast %cst_36 : f32 to vector<16x1xf32>
    %108 = arith.divf %106, %107 : vector<16x1xf32>
    %109 = vector.broadcast %101 : vector<16x1xf32> to vector<16x32xf32>
    %110 = arith.subf %95, %109 : vector<16x32xf32>
    %cst_37 = arith.constant 9.99999974E-6 : f32
    %111 = vector.broadcast %cst_37 : f32 to vector<16x1xf32>
    %112 = arith.addf %108, %111 : vector<16x1xf32>
    %113 = math.rsqrt %112 : vector<16x1xf32>
    %114 = vector.broadcast %113 : vector<16x1xf32> to vector<16x32xf32>
    %115 = arith.mulf %110, %114 : vector<16x32xf32>
    %116 = vector.broadcast %96 : vector<1x32xf32> to vector<16x32xf32>
    %117 = arith.mulf %115, %116 : vector<16x32xf32>
    %118 = vector.broadcast %97 : vector<1x32xf32> to vector<16x32xf32>
    %119 = arith.addf %117, %118 : vector<16x32xf32>
    %120 = vector.extract_strided_slice %4 {offsets = [0, 128], sizes = [32, 32], strides = [1, 1]} : vector<32x256xf32> to vector<32x32xf32>
    %cst_38 = arith.constant dense<0.000000e+00> : vector<16x32xf32>
    %121 = tpu.matmul %119, %120, %cst_38 {dimension_numbers = #tpu.dot_dimension_numbers<[1], [0], [0], [1], [0, 0, 1, 1], [], []>} : vector<16x32xf32>, vector<32x32xf32>, vector<16x32xf32> -> vector<16x32xf32>
    %122 = vector.extract_strided_slice %6 {offsets = [2, 0], sizes = [1, 32], strides = [1, 1]} : vector<8x128xf32> to vector<1x32xf32>
    %123 = vector.broadcast %122 : vector<1x32xf32> to vector<16x32xf32>
    %124 = arith.addf %121, %123 : vector<16x32xf32>
    %125 = vector.extract_strided_slice %4 {offsets = [0, 160], sizes = [32, 64], strides = [1, 1]} : vector<32x256xf32> to vector<32x64xf32>
    %cst_39 = arith.constant dense<0.000000e+00> : vector<24x64xf32>
    %126 = tpu.matmul %2, %125, %cst_39 {dimension_numbers = #tpu.dot_dimension_numbers<[1], [0], [0], [1], [0, 0, 1, 1], [], []>} : vector<24x32xf32>, vector<32x64xf32>, vector<24x64xf32> -> vector<24x64xf32>
    %127 = vector.extract_strided_slice %6 {offsets = [2, 32], sizes = [1, 64], strides = [1, 1]} : vector<8x128xf32> to vector<1x64xf32>
    %128 = vector.broadcast %127 : vector<1x64xf32> to vector<24x64xf32>
    %129 = arith.addf %126, %128 : vector<24x64xf32>
    %130 = vector.extract_strided_slice %129 {offsets = [0, 0], sizes = [24, 32], strides = [1, 1]} : vector<24x64xf32> to vector<24x32xf32>
    %131 = vector.extract_strided_slice %129 {offsets = [0, 32], sizes = [24, 32], strides = [1, 1]} : vector<24x64xf32> to vector<24x32xf32>
    %132 = vector.extract_strided_slice %4 {offsets = [0, 224], sizes = [32, 32], strides = [1, 1]} : vector<32x256xf32> to vector<32x32xf32>
    %133 = vector.extract_strided_slice %6 {offsets = [3, 0], sizes = [1, 32], strides = [1, 1]} : vector<8x128xf32> to vector<1x32xf32>
    %134 = vector.shape_cast %133 : vector<1x32xf32> to vector<1x32xf32>
    %135 = vector.broadcast %134 : vector<1x32xf32> to vector<16x32xf32>
    %136 = vector.extract_strided_slice %124 {offsets = [0, 0], sizes = [16, 8], strides = [1, 1]} : vector<16x32xf32> to vector<16x8xf32>
    %137 = vector.extract_strided_slice %130 {offsets = [0, 0], sizes = [24, 8], strides = [1, 1]} : vector<24x32xf32> to vector<24x8xf32>
    "tpu.trace_start"() <{level = 10 : i32, message = "md,nd->mn"}> : () -> ()
    %cst_40 = arith.constant dense<0.000000e+00> : vector<16x24xf32>
    %138 = tpu.matmul %136, %137, %cst_40 {dimension_numbers = #tpu.dot_dimension_numbers<[1], [1], [0], [0], [0, 0, 1, 0], [], []>} : vector<16x8xf32>, vector<24x8xf32>, vector<16x24xf32> -> vector<16x24xf32>
    "tpu.trace_stop"() : () -> ()
    %139 = arith.addf %138, %3 : vector<16x24xf32>
    %cst_41 = arith.constant dense<0xFF800000> : vector<16xf32>
    %140 = vector.multi_reduction <maximumf>, %139, %cst_41 [1] : vector<16x24xf32> to vector<16xf32>
    %141 = vector.shape_cast %140 : vector<16xf32> to vector<16x1xf32>
    %142 = vector.broadcast %141 : vector<16x1xf32> to vector<16x24xf32>
    %143 = arith.subf %139, %142 : vector<16x24xf32>
    %144 = math.exp %143 : vector<16x24xf32>
    %cst_42 = arith.constant dense<0.000000e+00> : vector<16xf32>
    %145 = vector.multi_reduction <add>, %144, %cst_42 [1] : vector<16x24xf32> to vector<16xf32>
    %146 = vector.shape_cast %145 : vector<16xf32> to vector<16x1xf32>
    %147 = tpu.reciprocal %146 {approx = true} : vector<16x1xf32> -> vector<16x1xf32>
    %148 = vector.broadcast %147 : vector<16x1xf32> to vector<16x24xf32>
    %149 = arith.mulf %144, %148 : vector<16x24xf32>
    %150 = vector.extract_strided_slice %131 {offsets = [0, 0], sizes = [24, 8], strides = [1, 1]} : vector<24x32xf32> to vector<24x8xf32>
    %cst_43 = arith.constant dense<0.000000e+00> : vector<16x8xf32>
    %151 = tpu.matmul %149, %150, %cst_43 {dimension_numbers = #tpu.dot_dimension_numbers<[1], [0], [0], [1], [0, 0, 1, 1], [], []>} : vector<16x24xf32>, vector<24x8xf32>, vector<16x8xf32> -> vector<16x8xf32>
    %152 = vector.extract_strided_slice %132 {offsets = [0, 0], sizes = [8, 32], strides = [1, 1]} : vector<32x32xf32> to vector<8x32xf32>
    %cst_44 = arith.constant dense<0.000000e+00> : vector<16x32xf32>
    %153 = tpu.matmul %151, %152, %cst_44 {dimension_numbers = #tpu.dot_dimension_numbers<[1], [0], [0], [1], [0, 0, 1, 1], [], []>} : vector<16x8xf32>, vector<8x32xf32>, vector<16x32xf32> -> vector<16x32xf32>
    %154 = arith.addf %135, %153 : vector<16x32xf32>
    %155 = vector.extract_strided_slice %124 {offsets = [0, 8], sizes = [16, 8], strides = [1, 1]} : vector<16x32xf32> to vector<16x8xf32>
    %156 = vector.extract_strided_slice %130 {offsets = [0, 8], sizes = [24, 8], strides = [1, 1]} : vector<24x32xf32> to vector<24x8xf32>
    "tpu.trace_start"() <{level = 10 : i32, message = "md,nd->mn"}> : () -> ()
    %cst_45 = arith.constant dense<0.000000e+00> : vector<16x24xf32>
    %157 = tpu.matmul %155, %156, %cst_45 {dimension_numbers = #tpu.dot_dimension_numbers<[1], [1], [0], [0], [0, 0, 1, 0], [], []>} : vector<16x8xf32>, vector<24x8xf32>, vector<16x24xf32> -> vector<16x24xf32>
    "tpu.trace_stop"() : () -> ()
    %158 = arith.addf %157, %3 : vector<16x24xf32>
    %cst_46 = arith.constant dense<0xFF800000> : vector<16xf32>
    %159 = vector.multi_reduction <maximumf>, %158, %cst_46 [1] : vector<16x24xf32> to vector<16xf32>
    %160 = vector.shape_cast %159 : vector<16xf32> to vector<16x1xf32>
    %161 = vector.broadcast %160 : vector<16x1xf32> to vector<16x24xf32>
    %162 = arith.subf %158, %161 : vector<16x24xf32>
    %163 = math.exp %162 : vector<16x24xf32>
    %cst_47 = arith.constant dense<0.000000e+00> : vector<16xf32>
    %164 = vector.multi_reduction <add>, %163, %cst_47 [1] : vector<16x24xf32> to vector<16xf32>
    %165 = vector.shape_cast %164 : vector<16xf32> to vector<16x1xf32>
    %166 = tpu.reciprocal %165 {approx = true} : vector<16x1xf32> -> vector<16x1xf32>
    %167 = vector.broadcast %166 : vector<16x1xf32> to vector<16x24xf32>
    %168 = arith.mulf %163, %167 : vector<16x24xf32>
    %169 = vector.extract_strided_slice %131 {offsets = [0, 8], sizes = [24, 8], strides = [1, 1]} : vector<24x32xf32> to vector<24x8xf32>
    %cst_48 = arith.constant dense<0.000000e+00> : vector<16x8xf32>
    %170 = tpu.matmul %168, %169, %cst_48 {dimension_numbers = #tpu.dot_dimension_numbers<[1], [0], [0], [1], [0, 0, 1, 1], [], []>} : vector<16x24xf32>, vector<24x8xf32>, vector<16x8xf32> -> vector<16x8xf32>
    %171 = vector.extract_strided_slice %132 {offsets = [8, 0], sizes = [8, 32], strides = [1, 1]} : vector<32x32xf32> to vector<8x32xf32>
    %cst_49 = arith.constant dense<0.000000e+00> : vector<16x32xf32>
    %172 = tpu.matmul %170, %171, %cst_49 {dimension_numbers = #tpu.dot_dimension_numbers<[1], [0], [0], [1], [0, 0, 1, 1], [], []>} : vector<16x8xf32>, vector<8x32xf32>, vector<16x32xf32> -> vector<16x32xf32>
    %173 = arith.addf %154, %172 : vector<16x32xf32>
    %174 = vector.extract_strided_slice %124 {offsets = [0, 16], sizes = [16, 8], strides = [1, 1]} : vector<16x32xf32> to vector<16x8xf32>
    %175 = vector.extract_strided_slice %130 {offsets = [0, 16], sizes = [24, 8], strides = [1, 1]} : vector<24x32xf32> to vector<24x8xf32>
    "tpu.trace_start"() <{level = 10 : i32, message = "md,nd->mn"}> : () -> ()
    %cst_50 = arith.constant dense<0.000000e+00> : vector<16x24xf32>
    %176 = tpu.matmul %174, %175, %cst_50 {dimension_numbers = #tpu.dot_dimension_numbers<[1], [1], [0], [0], [0, 0, 1, 0], [], []>} : vector<16x8xf32>, vector<24x8xf32>, vector<16x24xf32> -> vector<16x24xf32>
    "tpu.trace_stop"() : () -> ()
    %177 = arith.addf %176, %3 : vector<16x24xf32>
    %cst_51 = arith.constant dense<0xFF800000> : vector<16xf32>
    %178 = vector.multi_reduction <maximumf>, %177, %cst_51 [1] : vector<16x24xf32> to vector<16xf32>
    %179 = vector.shape_cast %178 : vector<16xf32> to vector<16x1xf32>
    %180 = vector.broadcast %179 : vector<16x1xf32> to vector<16x24xf32>
    %181 = arith.subf %177, %180 : vector<16x24xf32>
    %182 = math.exp %181 : vector<16x24xf32>
    %cst_52 = arith.constant dense<0.000000e+00> : vector<16xf32>
    %183 = vector.multi_reduction <add>, %182, %cst_52 [1] : vector<16x24xf32> to vector<16xf32>
    %184 = vector.shape_cast %183 : vector<16xf32> to vector<16x1xf32>
    %185 = tpu.reciprocal %184 {approx = true} : vector<16x1xf32> -> vector<16x1xf32>
    %186 = vector.broadcast %185 : vector<16x1xf32> to vector<16x24xf32>
    %187 = arith.mulf %182, %186 : vector<16x24xf32>
    %188 = vector.extract_strided_slice %131 {offsets = [0, 16], sizes = [24, 8], strides = [1, 1]} : vector<24x32xf32> to vector<24x8xf32>
    %cst_53 = arith.constant dense<0.000000e+00> : vector<16x8xf32>
    %189 = tpu.matmul %187, %188, %cst_53 {dimension_numbers = #tpu.dot_dimension_numbers<[1], [0], [0], [1], [0, 0, 1, 1], [], []>} : vector<16x24xf32>, vector<24x8xf32>, vector<16x8xf32> -> vector<16x8xf32>
    %190 = vector.extract_strided_slice %132 {offsets = [16, 0], sizes = [8, 32], strides = [1, 1]} : vector<32x32xf32> to vector<8x32xf32>
    %cst_54 = arith.constant dense<0.000000e+00> : vector<16x32xf32>
    %191 = tpu.matmul %189, %190, %cst_54 {dimension_numbers = #tpu.dot_dimension_numbers<[1], [0], [0], [1], [0, 0, 1, 1], [], []>} : vector<16x8xf32>, vector<8x32xf32>, vector<16x32xf32> -> vector<16x32xf32>
    %192 = arith.addf %173, %191 : vector<16x32xf32>
    %193 = vector.extract_strided_slice %124 {offsets = [0, 24], sizes = [16, 8], strides = [1, 1]} : vector<16x32xf32> to vector<16x8xf32>
    %194 = vector.extract_strided_slice %130 {offsets = [0, 24], sizes = [24, 8], strides = [1, 1]} : vector<24x32xf32> to vector<24x8xf32>
    "tpu.trace_start"() <{level = 10 : i32, message = "md,nd->mn"}> : () -> ()
    %cst_55 = arith.constant dense<0.000000e+00> : vector<16x24xf32>
    %195 = tpu.matmul %193, %194, %cst_55 {dimension_numbers = #tpu.dot_dimension_numbers<[1], [1], [0], [0], [0, 0, 1, 0], [], []>} : vector<16x8xf32>, vector<24x8xf32>, vector<16x24xf32> -> vector<16x24xf32>
    "tpu.trace_stop"() : () -> ()
    %196 = arith.addf %195, %3 : vector<16x24xf32>
    %cst_56 = arith.constant dense<0xFF800000> : vector<16xf32>
    %197 = vector.multi_reduction <maximumf>, %196, %cst_56 [1] : vector<16x24xf32> to vector<16xf32>
    %198 = vector.shape_cast %197 : vector<16xf32> to vector<16x1xf32>
    %199 = vector.broadcast %198 : vector<16x1xf32> to vector<16x24xf32>
    %200 = arith.subf %196, %199 : vector<16x24xf32>
    %201 = math.exp %200 : vector<16x24xf32>
    %cst_57 = arith.constant dense<0.000000e+00> : vector<16xf32>
    %202 = vector.multi_reduction <add>, %201, %cst_57 [1] : vector<16x24xf32> to vector<16xf32>
    %203 = vector.shape_cast %202 : vector<16xf32> to vector<16x1xf32>
    %204 = tpu.reciprocal %203 {approx = true} : vector<16x1xf32> -> vector<16x1xf32>
    %205 = vector.broadcast %204 : vector<16x1xf32> to vector<16x24xf32>
    %206 = arith.mulf %201, %205 : vector<16x24xf32>
    %207 = vector.extract_strided_slice %131 {offsets = [0, 24], sizes = [24, 8], strides = [1, 1]} : vector<24x32xf32> to vector<24x8xf32>
    %cst_58 = arith.constant dense<0.000000e+00> : vector<16x8xf32>
    %208 = tpu.matmul %206, %207, %cst_58 {dimension_numbers = #tpu.dot_dimension_numbers<[1], [0], [0], [1], [0, 0, 1, 1], [], []>} : vector<16x24xf32>, vector<24x8xf32>, vector<16x8xf32> -> vector<16x8xf32>
    %209 = vector.extract_strided_slice %132 {offsets = [24, 0], sizes = [8, 32], strides = [1, 1]} : vector<32x32xf32> to vector<8x32xf32>
    %cst_59 = arith.constant dense<0.000000e+00> : vector<16x32xf32>
    %210 = tpu.matmul %208, %209, %cst_59 {dimension_numbers = #tpu.dot_dimension_numbers<[1], [0], [0], [1], [0, 0, 1, 1], [], []>} : vector<16x8xf32>, vector<8x32xf32>, vector<16x32xf32> -> vector<16x32xf32>
    %211 = arith.addf %192, %210 : vector<16x32xf32>
    %212 = arith.addf %211, %119 : vector<16x32xf32>
    %213 = vector.extract_strided_slice %6 {offsets = [6, 32], sizes = [1, 32], strides = [1, 1]} : vector<8x128xf32> to vector<1x32xf32>
    %214 = vector.extract_strided_slice %6 {offsets = [7, 32], sizes = [1, 32], strides = [1, 1]} : vector<8x128xf32> to vector<1x32xf32>
    %cst_60 = arith.constant dense<0.000000e+00> : vector<16xf32>
    %215 = vector.multi_reduction <add>, %212, %cst_60 [1] : vector<16x32xf32> to vector<16xf32>
    %216 = vector.shape_cast %215 : vector<16xf32> to vector<16x1xf32>
    %cst_61 = arith.constant 3.200000e+01 : f32
    %217 = vector.broadcast %cst_61 : f32 to vector<16x1xf32>
    %218 = arith.divf %216, %217 : vector<16x1xf32>
    %219 = vector.broadcast %218 : vector<16x1xf32> to vector<16x32xf32>
    %220 = arith.subf %212, %219 : vector<16x32xf32>
    %221 = arith.mulf %220, %220 : vector<16x32xf32>
    %cst_62 = arith.constant dense<0.000000e+00> : vector<16xf32>
    %222 = vector.multi_reduction <add>, %221, %cst_62 [1] : vector<16x32xf32> to vector<16xf32>
    %223 = vector.shape_cast %222 : vector<16xf32> to vector<16x1xf32>
    %cst_63 = arith.constant 3.200000e+01 : f32
    %224 = vector.broadcast %cst_63 : f32 to vector<16x1xf32>
    %225 = arith.divf %223, %224 : vector<16x1xf32>
    %226 = vector.broadcast %218 : vector<16x1xf32> to vector<16x32xf32>
    %227 = arith.subf %212, %226 : vector<16x32xf32>
    %cst_64 = arith.constant 9.99999974E-6 : f32
    %228 = vector.broadcast %cst_64 : f32 to vector<16x1xf32>
    %229 = arith.addf %225, %228 : vector<16x1xf32>
    %230 = math.rsqrt %229 : vector<16x1xf32>
    %231 = vector.broadcast %230 : vector<16x1xf32> to vector<16x32xf32>
    %232 = arith.mulf %227, %231 : vector<16x32xf32>
    %233 = vector.broadcast %213 : vector<1x32xf32> to vector<16x32xf32>
    %234 = arith.mulf %232, %233 : vector<16x32xf32>
    %235 = vector.broadcast %214 : vector<1x32xf32> to vector<16x32xf32>
    %236 = arith.addf %234, %235 : vector<16x32xf32>
    %237 = vector.extract_strided_slice %5 {offsets = [0, 0], sizes = [32, 64], strides = [1, 1]} : vector<96x64xf32> to vector<32x64xf32>
    %cst_65 = arith.constant dense<0.000000e+00> : vector<16x64xf32>
    %238 = tpu.matmul %236, %237, %cst_65 {dimension_numbers = #tpu.dot_dimension_numbers<[1], [0], [0], [1], [0, 0, 1, 1], [], []>} : vector<16x32xf32>, vector<32x64xf32>, vector<16x64xf32> -> vector<16x64xf32>
    %239 = vector.extract_strided_slice %6 {offsets = [4, 0], sizes = [1, 64], strides = [1, 1]} : vector<8x128xf32> to vector<1x64xf32>
    %240 = vector.broadcast %239 : vector<1x64xf32> to vector<16x64xf32>
    %241 = arith.addf %238, %240 : vector<16x64xf32>
    %cst_66 = arith.constant 0.000000e+00 : f32
    %242 = vector.broadcast %cst_66 : f32 to vector<16x64xf32>
    %243 = arith.maximumf %241, %242 : vector<16x64xf32>
    %244 = vector.extract_strided_slice %5 {offsets = [32, 0], sizes = [64, 32], strides = [1, 1]} : vector<96x64xf32> to vector<64x32xf32>
    %cst_67 = arith.constant dense<0.000000e+00> : vector<16x32xf32>
    %245 = tpu.matmul %243, %244, %cst_67 {dimension_numbers = #tpu.dot_dimension_numbers<[1], [0], [0], [1], [0, 0, 1, 1], [], []>} : vector<16x64xf32>, vector<64x32xf32>, vector<16x32xf32> -> vector<16x32xf32>
    %246 = vector.extract_strided_slice %6 {offsets = [5, 0], sizes = [1, 32], strides = [1, 1]} : vector<8x128xf32> to vector<1x32xf32>
    %247 = vector.broadcast %246 : vector<1x32xf32> to vector<16x32xf32>
    %248 = arith.addf %245, %247 : vector<16x32xf32>
    %249 = arith.addf %248, %236 : vector<16x32xf32>
    %250 = vector.extract_strided_slice %6 {offsets = [6, 64], sizes = [1, 32], strides = [1, 1]} : vector<8x128xf32> to vector<1x32xf32>
    %251 = vector.extract_strided_slice %6 {offsets = [7, 64], sizes = [1, 32], strides = [1, 1]} : vector<8x128xf32> to vector<1x32xf32>
    %cst_68 = arith.constant dense<0.000000e+00> : vector<16xf32>
    %252 = vector.multi_reduction <add>, %249, %cst_68 [1] : vector<16x32xf32> to vector<16xf32>
    %253 = vector.shape_cast %252 : vector<16xf32> to vector<16x1xf32>
    %cst_69 = arith.constant 3.200000e+01 : f32
    %254 = vector.broadcast %cst_69 : f32 to vector<16x1xf32>
    %255 = arith.divf %253, %254 : vector<16x1xf32>
    %256 = vector.broadcast %255 : vector<16x1xf32> to vector<16x32xf32>
    %257 = arith.subf %249, %256 : vector<16x32xf32>
    %258 = arith.mulf %257, %257 : vector<16x32xf32>
    %cst_70 = arith.constant dense<0.000000e+00> : vector<16xf32>
    %259 = vector.multi_reduction <add>, %258, %cst_70 [1] : vector<16x32xf32> to vector<16xf32>
    %260 = vector.shape_cast %259 : vector<16xf32> to vector<16x1xf32>
    %cst_71 = arith.constant 3.200000e+01 : f32
    %261 = vector.broadcast %cst_71 : f32 to vector<16x1xf32>
    %262 = arith.divf %260, %261 : vector<16x1xf32>
    %263 = vector.broadcast %255 : vector<16x1xf32> to vector<16x32xf32>
    %264 = arith.subf %249, %263 : vector<16x32xf32>
    %cst_72 = arith.constant 9.99999974E-6 : f32
    %265 = vector.broadcast %cst_72 : f32 to vector<16x1xf32>
    %266 = arith.addf %262, %265 : vector<16x1xf32>
    %267 = math.rsqrt %266 : vector<16x1xf32>
    %268 = vector.broadcast %267 : vector<16x1xf32> to vector<16x32xf32>
    %269 = arith.mulf %264, %268 : vector<16x32xf32>
    %270 = vector.broadcast %250 : vector<1x32xf32> to vector<16x32xf32>
    %271 = arith.mulf %269, %270 : vector<16x32xf32>
    %272 = vector.broadcast %251 : vector<1x32xf32> to vector<16x32xf32>
    %273 = arith.addf %271, %272 : vector<16x32xf32>
    %c0_73 = arith.constant 0 : index
    %c0_74 = arith.constant 0 : index
    %274 = vector.load %arg7[%c0_73, %c0_74] : memref<16x32xf32, #tpu.memory_space<vmem>>, vector<16x32xf32>
    tpu.vector_store %arg7[%c0_73, %c0_74], %273 {strides = array<i32>} : memref<16x32xf32, #tpu.memory_space<vmem>>, vector<16x32xf32>,
    return
  }
}

</mosaic_0001>

<bundles_post_ra>
// kernel: tpu_custom_call.1
= control target key start
LH: loop header
LB: loop body
LE: loop exit
PB: predicated region body
PF: predicated region fallthrough
CT: control target
= control target key end

     0   :  { %s2294_s0 = inlined_call_operand.vmem [shape: f32[16,32], index: 0, kind: input, shape index: {}]   ;;  %s2295_s1 = inlined_call_operand.vmem [shape: f32[16,16], index: 1, kind: input, shape index: {}]   ;;  %s2296_s2 = inlined_call_operand.vmem [shape: f32[24,32], index: 2, kind: input, shape index: {}]   ;;  %s2297_s3 = inlined_call_operand.vmem [shape: f32[16,24], index: 3, kind: input, shape index: {}]   ;;  %s2298_s4 = inlined_call_operand.vmem [shape: f32[32,256], index: 4, kind: input, shape index: {}]   ;;  %s2299_s5 = inlined_call_operand.vmem [shape: f32[96,64], index: 5, kind: input, shape index: {}]   ;;  %s2300_s6 = inlined_call_operand.vmem [shape: f32[8,128], index: 6, kind: input, shape index: {}]   ;;  %s2301_s7 = inlined_call_operand.hbm [shape: f32[16,32], index: 7, kind: output, shape index: {}]  }
   0x1   :  { %v1824_v0 = vld [vmem:[%s2298_s4 + $0x30] sm:$0xff]  ;;  %v1829_v1 = vld [vmem:[%s2298_s4 + $0x20] sm:$0xff] }
   0x2   :  { %77 = vmatpush.msra.mxu0 %v1824_v0  ;;  %v1615_v2 = vpack.i.bf16 %v1824_v0, %v1829_v1  ;;  %v1837_v3 = vld [vmem:[%s2298_s4 + $0x10] sm:$0xff] }
   0x3   :  { %12 = vsyncpa [#allocation3], 0  ;;  %v36_v4 = vld [vmem:[%s2298_s4] sm:$0xff]  ;;  %vm58_vm0 = vcmask 261120   ;;  %v1854_v6 = vld [vmem:[%s2294_s0 + $0x8] sm:$0xff]  ;;  %s1765_s15 = smov 96  }
   0x4   :  { %78 = vmatpush.msra.mxu0 %v1829_v1  ;;  %v1847_v5 = vld [vmem:[%s2294_s0] sm:$0xff]  ;;  %vm95_vm1 = vcmask 64512   ;;  %vm127_vm2 = vcmask 130048   ;;  %v1888_v19 = vld [vmem:[%s2295_s1 + $0x8] sm:$0xff]  ;;  %s1766_s19 = smov 32   ;;  %s1767_s20 = smov 120  }
   0x5   :  { %v1861_v8 = vld [vmem:[%s2300_s6] sm:$0xff]  ;;  %s1769_s21 = smov 56   ;;  %s1770_s22 = smov 88   ;;  %vm796_vm10 = vcmask 195584  }
   0x6   :  { %79 = vmatpush.msra.mxu0 %v1837_v3  ;;  %v57_v9 = vperm.slane %v1861_v8, 0  ;;  %v1881_v15 = vld [vmem:[%s2295_s1] sm:$0xff]  ;;  %s1768_s1 = smov 64   ;;  %s1771_s23 = smov 80  }
   0x7   :  { %s1772_s24 = smov 112   ;;  %s1773_s25 = smov 72  }
   0x8   :  { %80 = vmatpush.msra.mxu0 %v36_v4  ;;  %s1774_s26 = smov 104   ;;  %s1775_s27 = smov 48  }
   0x9   :  { %1499 = vmatmul.msk.f32.vlgmr.msra.gmra.mxu0 %vm58_vm0, %v1847_v5  ;;  %s1776_s28 = smov 40  }
  0x11   :  { %1500 = vmatmul.msk.f32.gmra.mxu0 %vm58_vm0, %v1854_v6 }
  0x86   :  { %v82_v7 = vpop.f32.mrf.mxu0 }
  0x87   :  { %v1868_v12 = vadd.f32 %v82_v7, %v57_v9 }
  0x8e   :  { %v85_v10 = vpop.f32.mrf.mxu0 }
  0x8f   :  { %v1864_v11 = vadd.f32 %v85_v10, %v57_v9 }
  0x91   :  { %93 = vrot.lane.b32.xlu0 %v1864_v11, %s1765_s15  ;;  %v1899_v34 = vpack.i.bf16 %v1868_v12, %v1864_v11 }
  0x99   :  { %91 = vrot.lane.b32.xlu0 %v1868_v12, %s1765_s15 }
 0x103   :  { %v94_v13 = vpop.permute.xlu0 %93 }
 0x104   :  { %1501 = vmatpush.xpose.msk.msra.mxu1 %vm95_vm1, %v94_v13 }
 0x10b   :  { %v92_v14 = vpop.permute.xlu0 %91 }
 0x10c   :  { %1502 = vmatpush.xpose.msk.msra.mxu1 %vm95_vm1, %v92_v14 }
 0x10f   :  { %1503 = vmatmul.msk.f32.vlgmr.msra.gmra.mxu1 %vm95_vm1, %v1868_v12 }
 0x117   :  { %1504 = vmatmul.msk.f32.gmra.mxu1 %vm95_vm1, %v1864_v11 }
 0x18c   :  { %v121_v16 = vpop.f32.mrf.mxu1 }
 0x18d   :  { %v122_v17 = vadd.f32 %v121_v16, %v1881_v15 }
 0x18f   :  { %v128_v18 = vsel %vm127_vm2, %v122_v17, -inf }
 0x190   :  { %129 = vmax.xlane.f32.xlu1 %v128_v18 }
 0x194   :  { %v124_v20 = vpop.f32.mrf.mxu1 }
 0x195   :  { %v125_v21 = vadd.f32 %v124_v20, %v1888_v19 }
 0x197   :  { %v131_v22 = vsel %vm127_vm2, %v125_v21, -inf }
 0x198   :  { %132 = vmax.xlane.f32.xlu1 %v131_v22 }
 0x1b1   :  { %186 = vrot.lane.b32.xlu1 %v36_v4, %s1766_s19 }
 0x1b9   :  { %220 = vrot.lane.b32.xlu1 %v1868_v12, %s1767_s20 }
 0x203   :  { %v130_v23 = vpop.xlane.xlu1 %129 }
 0x204   :  { %v134_v24 = vsub.f32 %v122_v17, %v130_v23 }
 0x206   :  { %v136_v25 = vmul.f32 1.442695, %v134_v24 }
 0x208   :  { %1660 = vpow2.f32 %v136_v25 }
 0x20b   :  { %v133_v26 = vpop.xlane.xlu1 %132 }
 0x20c   :  { %v135_v27 = vsub.f32 %v125_v21, %v133_v26 }
 0x20e   :  { %v1661_v28 = vpop.eup %1660  ;;  %v138_v29 = vmul.f32 1.442695, %v135_v27 }
 0x20f   :  { %v140_v30 = vsel %vm127_vm2, %v1661_v28, 0.0 }
 0x210   :  { %1662 = vpow2.f32 %v138_v29  ;;  %141 = vadd.xlane.f32.xlu2 %v140_v30 }
 0x216   :  { %v1663_v31 = vpop.eup %1662 }
 0x217   :  { %v143_v32 = vsel %vm127_vm2, %v1663_v31, 0.0 }
 0x218   :  { %144 = vadd.xlane.f32.xlu0 %v143_v32 }
 0x223   :  { %v187_v33 = vpop.permute.xlu1 %186 }
 0x224   :  { %1578 = vmatpush.msra.mxu3 %v187_v33 }
 0x228   :  { %1596 = vrot.lane.b32.xlu2 %v1899_v34, %s1768_s1 }
 0x22b   :  { %v221_v51 = vpop.permute.xlu1 %220 }
 0x22c   :  { %1601 = vrot.lane.b32.xlu0 %v1899_v34, %s1769_s21 }
 0x230   :  { %226 = vrot.lane.b32.xlu2 %v1864_v11, %s1770_s22 }
 0x238   :  { %224 = vrot.lane.b32.xlu2 %v1868_v12, %s1770_s22 }
 0x240   :  { %222 = vrot.lane.b32.xlu2 %v1864_v11, %s1767_s20 }
 0x283   :  { %v142_v35 = vpop.xlane.xlu2 %141 }
 0x284   :  { %1664 = vrcp.f32 %v142_v35 }
 0x28a   :  { %v1665_v38 = vpop.eup %1664 }
 0x28b   :  { %v1597_v36 = vpop.permute.xlu2 %1596  ;;  %v145_v37 = vpop.xlane.xlu0 %144  ;;  %v148_v41 = vmul.f32 %v1665_v38, %v1661_v28 }
 0x28c   :  { %v1598_v39 = vunpack.i.l.bf16 %v1597_v36  ;;  %1666 = vrcp.f32 %v145_v37  ;;  %v1599_v40 = vunpack.i.h.bf16 %v1597_v36 }
 0x28e   :  { %176 = vmatpush.msra.mxu2 %v1598_v39 }
 0x290   :  { %177 = vmatpush.msra.mxu2 %v1599_v40 }
 0x291   :  { %1505 = vmatmul.msk.f32.vlgmr.msra.gmra.mxu2 %vm127_vm2, %v148_v41 }
 0x292   :  { %210 = vmatpush.msrb.mxu2 %v187_v33  ;;  %v1667_v43 = vpop.eup %1666 }
 0x293   :  { %v227_v42 = vpop.permute.xlu2 %226  ;;  %v149_v44 = vmul.f32 %v1667_v43, %v1663_v31 }
 0x294   :  { %1509 = vmatpush.xpose.msk.msrb.mxu3 %vm95_vm1, %v227_v42 }
 0x299   :  { %1506 = vmatmul.msk.f32.gmra.mxu2 %vm127_vm2, %v149_v44 }
 0x29b   :  { %v225_v45 = vpop.permute.xlu2 %224 }
 0x29c   :  { %1510 = vmatpush.xpose.msk.msrb.mxu3 %vm95_vm1, %v225_v45  ;;  %v88_v45 = vperm.slane %v1861_v8, 1 }
 0x29e   :  { %v1602_v46 = vpop.permute.xlu0 %1601 }
 0x29f   :  { %v1603_v47 = vunpack.i.l.bf16 %v1602_v46  ;;  %v1604_v48 = vunpack.i.h.bf16 %v1602_v46 }
 0x2a1   :  { %307 = vmatpush.msra.mxu2 %v1603_v47 }
 0x2a3   :  { %308 = vmatpush.msra.mxu2 %v1604_v48  ;;  %v223_v52 = vpop.permute.xlu2 %222 }
 0x314   :  { %v179_v49 = vpop.f32.mrf.mxu2 }
 0x315   :  { %1507 = vmatmul.msk.f32.vlgmr.msrb.gmra.mxu2 %vm95_vm1, %v179_v49 }
 0x31c   :  { %v182_v50 = vpop.f32.mrf.mxu2 }
 0x31d   :  { %1508 = vmatmul.msk.f32.vlgmr.msra.gmra.mxu3 %vm95_vm1, %v182_v50 }
 0x325   :  { %1511 = vmatmul.msk.f32.vlgmr.msrb.gmra.mxu3 %vm95_vm1, %v221_v51 }
 0x32d   :  { %1512 = vmatmul.msk.f32.gmra.mxu3 %vm95_vm1, %v223_v52 }
 0x398   :  { %v1956_v33 = vpop.f32.mrf.mxu2 }
 0x3a0   :  { %v1918_v53 = vpop.f32.mrf.mxu3 }
 0x3a1   :  { %v219_v46 = vadd.f32 %v1918_v53, %v88_v45 }
 0x3a8   :  { %v253_v54 = vpop.f32.mrf.mxu3 }
 0x3a9   :  { %v254_v55 = vadd.f32 %v253_v54, %v1881_v15 }
 0x3ab   :  { %v259_v56 = vsel %vm127_vm2, %v254_v55, -inf }
 0x3ac   :  { %260 = vmax.xlane.f32.xlu1 %v259_v56 }
 0x3b0   :  { %v256_v57 = vpop.f32.mrf.mxu3 }
 0x3b1   :  { %v257_v58 = vadd.f32 %v256_v57, %v1888_v19 }
 0x3b3   :  { %v262_v59 = vsel %vm127_vm2, %v257_v58, -inf }
 0x3b4   :  { %263 = vmax.xlane.f32.xlu2 %v262_v59 }
 0x3c5   :  { %317 = vrot.lane.b32.xlu1 %v1837_v3, %s1766_s19 }
 0x3cc   :  { %357 = vrot.lane.b32.xlu2 %v1864_v11, %s1771_s23 }
 0x3cd   :  { %355 = vrot.lane.b32.xlu1 %v1868_v12, %s1771_s23 }
 0x3d4   :  { %351 = vrot.lane.b32.xlu2 %v1868_v12, %s1772_s24 }
 0x3d5   :  { %488 = vrot.lane.b32.xlu1 %v1864_v11, %s1773_s25 }
 0x3dc   :  { %353 = vrot.lane.b32.xlu2 %v1864_v11, %s1772_s24 }
 0x3dd   :  { %482 = vrot.lane.b32.xlu1 %v1868_v12, %s1774_s26 }
 0x3e4   :  { %484 = vrot.lane.b32.xlu2 %v1864_v11, %s1774_s26 }
 0x41f   :  { %v261_v60 = vpop.xlane.xlu1 %260 }
 0x420   :  { %v265_v61 = vsub.f32 %v254_v55, %v261_v60 }
 0x422   :  { %v267_v62 = vmul.f32 1.442695, %v265_v61 }
 0x424   :  { %1668 = vpow2.f32 %v267_v62 }
 0x427   :  { %v264_v63 = vpop.xlane.xlu2 %263 }
 0x428   :  { %v266_v3 = vsub.f32 %v257_v58, %v264_v63 }
 0x42a   :  { %v1669_v4 = vpop.eup %1668  ;;  %v269_v7 = vmul.f32 1.442695, %v266_v3 }
 0x42b   :  { %v271_v9 = vsel %vm127_vm2, %v1669_v4, 0.0 }
 0x42c   :  { %1670 = vpow2.f32 %v269_v7  ;;  %272 = vadd.xlane.f32.xlu0 %v271_v9 }
 0x42f   :  { %v358_v10 = vpop.permute.xlu2 %357 }
 0x430   :  { %1517 = vmatpush.xpose.msk.msrb.mxu1 %vm95_vm1, %v358_v10 }
 0x432   :  { %v1671_v13 = vpop.eup %1670 }
 0x433   :  { %v274_v14 = vsel %vm127_vm2, %v1671_v13, 0.0 }
 0x434   :  { %275 = vadd.xlane.f32.xlu0 %v274_v14 }
 0x437   :  { %v318_v11 = vpop.permute.xlu1 %317  ;;  %v352_v17 = vpop.permute.xlu2 %351 }
 0x438   :  { %341 = vmatpush.msrb.mxu0 %v318_v11 }
 0x43f   :  { %v356_v16 = vpop.permute.xlu1 %355  ;;  %v354_v20 = vpop.permute.xlu2 %353 }
 0x440   :  { %1518 = vmatpush.xpose.msk.msrb.mxu1 %vm95_vm1, %v356_v16 }
 0x443   :  { %1519 = vmatmul.msk.f32.vlgmr.msrb.gmra.mxu1 %vm95_vm1, %v352_v17 }
 0x447   :  { %v489_v18 = vpop.permute.xlu1 %488  ;;  %v485_v43 = vpop.permute.xlu2 %484 }
 0x448   :  { %486 = vrot.lane.b32.xlu0 %v1868_v12, %s1773_s25  ;;  %1525 = vmatpush.xpose.msk.msra.mxu0 %vm95_vm1, %v489_v18 }
 0x44b   :  { %1520 = vmatmul.msk.f32.gmra.mxu1 %vm95_vm1, %v354_v20 }
 0x44f   :  { %v483_v36 = vpop.permute.xlu1 %482 }
 0x49f   :  { %v273_v21 = vpop.xlane.xlu0 %272 }
 0x4a0   :  { %1672 = vrcp.f32 %v273_v21 }
 0x4a6   :  { %v1673_v22 = vpop.eup %1672 }
 0x4a7   :  { %v279_v23 = vmul.f32 %v1673_v22, %v1669_v4  ;;  %v276_v24 = vpop.xlane.xlu0 %275 }
 0x4a8   :  { %1674 = vrcp.f32 %v276_v24 }
 0x4a9   :  { %1513 = vmatmul.msk.f32.vlgmr.msra.gmra.mxu2 %vm127_vm2, %v279_v23 }
 0x4ae   :  { %v1675_v25 = vpop.eup %1674 }
 0x4af   :  { %v280_v26 = vmul.f32 %v1675_v25, %v1671_v13 }
 0x4b1   :  { %1514 = vmatmul.msk.f32.gmra.mxu2 %vm127_vm2, %v280_v26 }
 0x4ba   :  { %v487_v27 = vpop.permute.xlu0 %486 }
 0x4bb   :  { %1526 = vmatpush.xpose.msk.msra.mxu0 %vm95_vm1, %v487_v27 }
 0x4c0   :  { %v384_v12 = vpop.f32.mrf.mxu1 }
 0x4c1   :  { %v385_v28 = vadd.f32 %v384_v12, %v1881_v15 }
 0x4c3   :  { %v390_v29 = vsel %vm127_vm2, %v385_v28, -inf }
 0x4c4   :  { %391 = vmax.xlane.f32.xlu1 %v390_v29 }
 0x4c8   :  { %v387_v30 = vpop.f32.mrf.mxu1 }
 0x4c9   :  { %v388_v31 = vadd.f32 %v387_v30, %v1888_v19 }
 0x4cb   :  { %v393_v32 = vsel %vm127_vm2, %v388_v31, -inf }
 0x4cc   :  { %394 = vmax.xlane.f32.xlu2 %v393_v32 }
 0x52c   :  { %v310_v35 = vpop.f32.mrf.mxu2 }
 0x52d   :  { %1515 = vmatmul.msk.f32.vlgmr.msrb.gmra.mxu0 %vm95_vm1, %v310_v35  ;;  %v1995_v35 = vld [vmem:[%s2298_s4 + $0x28] sm:$0xff] }
 0x534   :  { %v313_v37 = vpop.f32.mrf.mxu2 }
 0x535   :  { %1516 = vmatmul.msk.f32.gmra.mxu0 %vm95_vm1, %v313_v37 }
 0x537   :  { %v392_v38 = vpop.xlane.xlu1 %391 }
 0x538   :  { %v396_v39 = vsub.f32 %v385_v28, %v392_v38 }
 0x53a   :  { %v398_v40 = vmul.f32 1.442695, %v396_v39  ;;  %v218_v39 = vadd.f32 %v1956_v33, %v88_v45  ;;  %v1777_v33 = vmov 32.0  }
 0x53c   :  { %1676 = vpow2.f32 %v398_v40 }
 0x53d   :  { %1527 = vmatmul.msk.f32.vlgmr.msra.gmra.mxu0 %vm95_vm1, %v483_v36  ;;  %v2000_v36 = vld [vmem:[%s2298_s4 + $0x38] sm:$0xff] }
 0x53e   :  { %v1620_v37 = vpack.i.bf16 %v1995_v35, %v2000_v36 }
 0x53f   :  { %v395_v49 = vpop.xlane.xlu2 %394 }
 0x540   :  { %v397_v52 = vsub.f32 %v388_v31, %v395_v49 }
 0x542   :  { %v1677_v41 = vpop.eup %1676  ;;  %v400_v55 = vmul.f32 1.442695, %v397_v52 }
 0x543   :  { %v402_v42 = vsel %vm127_vm2, %v1677_v41, 0.0 }
 0x544   :  { %403 = vadd.xlane.f32.xlu2 %v402_v42  ;;  %1678 = vpow2.f32 %v400_v55 }
 0x545   :  { %1528 = vmatmul.msk.f32.gmra.mxu0 %vm95_vm1, %v485_v43 }
 0x54a   :  { %v1679_v53 = vpop.eup %1678 }
 0x54b   :  { %v405_v59 = vsel %vm127_vm2, %v1679_v53, 0.0 }
 0x5aa   :  { %v1963_v44 = vpop.f32.mrf.mxu0 }
 0x5ab   :  { %v349_v40 = vadd.f32 %v1963_v44, %v218_v39 }
 0x5b2   :  { %v346_v47 = vpop.f32.mrf.mxu0 }
 0x5b3   :  { %v1969_v48 = vadd.f32 %v346_v47, %v219_v46 }
 0x5b7   :  { %v404_v3 = vpop.xlane.xlu2 %403 }
 0x5ba   :  { %v515_v50 = vpop.f32.mrf.mxu0 }
 0x5bb   :  { %v516_v51 = vadd.f32 %v515_v50, %v1881_v15 }
 0x5bd   :  { %v521_v54 = vsel %vm127_vm2, %v516_v51, -inf }
 0x5be   :  { %522 = vmax.xlane.f32.xlu0 %v521_v54 }
 0x5c2   :  { %v518_v56 = vpop.f32.mrf.mxu0 }
 0x5c3   :  { %v519_v57 = vadd.f32 %v518_v56, %v1888_v19 }
 0x5c5   :  { %v524_v58 = vsel %vm127_vm2, %v519_v57, -inf }
 0x5c6   :  { %525 = vmax.xlane.f32.xlu1 %v524_v58 }
 0x5ce   :  { %406 = vadd.xlane.f32.xlu1 %v405_v59 }
 0x5d2   :  { %1606 = vrot.lane.b32.xlu0 %v1899_v34, %s1775_s27 }
 0x5da   :  { %1616 = vrot.lane.b32.xlu0 %v1615_v2, %s1766_s19 }
 0x5e7   :  { %1611 = vrot.lane.b32.xlu1 %v1899_v34, %s1776_s28 }
 0x5ef   :  { %1621 = vrot.lane.b32.xlu1 %v1620_v37, %s1765_s15 }
 0x631   :  { %v523_v15 = vpop.xlane.xlu0 %522 }
 0x632   :  { %v527_v19 = vsub.f32 %v516_v51, %v523_v15 }
 0x634   :  { %v529_v60 = vmul.f32 1.442695, %v527_v19 }
 0x636   :  { %1680 = vpow2.f32 %v529_v60 }
 0x639   :  { %v526_v61 = vpop.xlane.xlu1 %525 }
 0x63a   :  { %v528_v62 = vsub.f32 %v519_v57, %v526_v61 }
 0x63c   :  { %v1681_v63 = vpop.eup %1680  ;;  %v531_v4 = vmul.f32 1.442695, %v528_v62 }
 0x63d   :  { %v533_v7 = vsel %vm127_vm2, %v1681_v63, 0.0 }
 0x63e   :  { %1682 = vpow2.f32 %v531_v4  ;;  %534 = vadd.xlane.f32.xlu2 %v533_v7 }
 0x63f   :  { %1684 = vrcp.f32 %v404_v3 }
 0x641   :  { %v407_v0 = vpop.xlane.xlu1 %406 }
 0x642   :  { %1686 = vrcp.f32 %v407_v0 }
 0x644   :  { %v1683_v9 = vpop.eup %1682  ;;  %v1607_v1 = vpop.permute.xlu0 %1606 }
 0x645   :  { %v1685_v2 = vpop.eup %1684  ;;  %v1608_v10 = vunpack.i.l.bf16 %v1607_v1  ;;  %v536_v34 = vsel %vm127_vm2, %v1683_v9, 0.0  ;;  %v1609_v13 = vunpack.i.h.bf16 %v1607_v1 }
 0x646   :  { %537 = vadd.xlane.f32.xlu2 %v536_v34  ;;  %v410_v14 = vmul.f32 %v1685_v2, %v1677_v41 }
 0x647   :  { %438 = vmatpush.msra.mxu3 %v1608_v10 }
 0x648   :  { %v1687_v11 = vpop.eup %1686 }
 0x649   :  { %439 = vmatpush.msra.mxu3 %v1609_v13  ;;  %v411_v16 = vmul.f32 %v1687_v11, %v1679_v53  ;;  %v2034_v13 = vperm.slane %v1861_v8, 2 }
 0x64a   :  { %1521 = vmatmul.msk.f32.vlgmr.msra.gmra.mxu3 %vm127_vm2, %v410_v14 }
 0x64c   :  { %v1617_v21 = vpop.permute.xlu0 %1616 }
 0x64d   :  { %v1619_v22 = vunpack.i.h.bf16 %v1617_v21  ;;  %v1618_v23 = vunpack.i.l.bf16 %v1617_v21 }
 0x64f   :  { %472 = vmatpush.msrb.mxu2 %v1618_v23  ;;  %603 = vmatpush.msrb.mxu3 %v1619_v22  ;;  %v31_v22 = vld [vmem:[%s2296_s2] sm:$0xff] }
 0x651   :  { %691 = vmatpush.msra.mxu2 %v2000_v36 }
 0x652   :  { %1522 = vmatmul.msk.f32.gmra.mxu3 %vm127_vm2, %v411_v16 }
 0x653   :  { %692 = vmatpush.msra.mxu2 %v1995_v35 }
 0x659   :  { %v1612_v17 = vpop.permute.xlu1 %1611 }
 0x65a   :  { %v1613_v18 = vunpack.i.l.bf16 %v1612_v17  ;;  %v1614_v20 = vunpack.i.h.bf16 %v1612_v17 }
 0x65c   :  { %569 = vmatpush.msra.mxu1 %v1613_v18 }
 0x65e   :  { %570 = vmatpush.msra.mxu1 %v1614_v20 }
 0x661   :  { %v1622_v59 = vpop.permute.xlu1 %1621 }
 0x662   :  { %v1624_v19 = vunpack.i.h.bf16 %v1622_v59  ;;  %v1623_v60 = vunpack.i.l.bf16 %v1622_v59 }
 0x664   :  { %743 = vmatpush.msrb.mxu0 %v1623_v60  ;;  %v2109_v60 = vld [vmem:[%s2297_s3] sm:$0xff] }
 0x666   :  { %744 = vmatpush.msrb.mxu0 %v1624_v19 }
 0x6b1   :  { %v535_v24 = vpop.xlane.xlu2 %534 }
 0x6b2   :  { %1688 = vrcp.f32 %v535_v24 }
 0x6b8   :  { %v1689_v25 = vpop.eup %1688 }
 0x6b9   :  { %v541_v26 = vmul.f32 %v1689_v25, %v1681_v63  ;;  %v538_v27 = vpop.xlane.xlu2 %537 }
 0x6ba   :  { %1690 = vrcp.f32 %v538_v27 }
 0x6bb   :  { %1529 = vmatmul.msk.f32.vlgmr.msra.gmra.mxu1 %vm127_vm2, %v541_v26  ;;  %1692 = vrcp.f32 %v1777_v33 }
 0x6c0   :  { %v1691_v12 = vpop.eup %1690 }
 0x6c1   :  { %v542_v28 = vmul.f32 %v1691_v12, %v1683_v9  ;;  %v1693_v44 = vpop.eup %1692  ;;  %v32_v12 = vld [vmem:[%s2296_s2 + $0x8] sm:$0xff] }
 0x6c2   :  { %v622_v45 = vmul.f32 32.0, %v1693_v44  ;;  %vm626_vm3 = vweird.f32 %v1693_v44 }
 0x6c3   :  { %1530 = vmatmul.msk.f32.gmra.mxu1 %vm127_vm2, %v542_v28  ;;  %vm1393_vm2 = vcmask 523264  }
 0x6c4   :  { %v623_v56 = vsub.f32 1.0, %v622_v45 }
 0x6c6   :  { %v624_v57 = vmul.f32 %v1693_v44, %v623_v56 }
 0x6cd   :  { %v441_v29 = vpop.f32.mrf.mxu3 }
 0x6ce   :  { %1523 = vmatmul.msk.f32.vlgmr.msrb.gmra.mxu2 %vm95_vm1, %v441_v29 }
 0x6d5   :  { %v444_v30 = vpop.f32.mrf.mxu3 }
 0x6d6   :  { %1524 = vmatmul.msk.f32.gmra.mxu2 %vm95_vm1, %v444_v30  ;;  %v2047_v30 = vperm.slane %v1861_v8, 6 }
 0x738   :  { %v572_v31 = vpop.f32.mrf.mxu1 }
 0x739   :  { %1531 = vmatmul.msk.f32.vlgmr.msrb.gmra.mxu3 %vm95_vm1, %v572_v31 }
 0x740   :  { %v575_v32 = vpop.f32.mrf.mxu1 }
 0x741   :  { %1532 = vmatmul.msk.f32.gmra.mxu3 %vm95_vm1, %v575_v32 }
 0x751   :  { %v474_v38 = vpop.f32.mrf.mxu2 }
 0x752   :  { %v480_v41 = vadd.f32 %v474_v38, %v349_v40  ;;  %v2051_v38 = vperm.slane %v1861_v8, 7 }
 0x759   :  { %v477_v47 = vpop.f32.mrf.mxu2 }
 0x75a   :  { %v481_v50 = vadd.f32 %v477_v47, %v1969_v48  ;;  %v37_v48 = vld [vmem:[%s2298_s4 + $0x8] sm:$0xff] }
 0x7bc   :  { %v605_v42 = vpop.f32.mrf.mxu3 }
 0x7bd   :  { %v611_v43 = vadd.f32 %v605_v42, %v480_v41 }
 0x7bf   :  { %v613_v46 = vadd.f32 %v611_v43, %v1847_v5  ;;  %v39_v5 = vld [vmem:[%s2298_s4 + $0x18] sm:$0xff]  ;;  %v33_v43 = vld [vmem:[%s2296_s2 + $0x10] sm:$0xff] }
 0x7c0   :  { %693 = vmatpush.msra.mxu2 %v39_v5  ;;  %v2028_v1 = vpack.i.bf16 %v37_v48, %v39_v5 }
 0x7c1   :  { %v615_v49 = vsel %vm58_vm0, %v613_v46, 0.0 }
 0x7c2   :  { %616 = vadd.xlane.f32.xlu2 %v615_v49  ;;  %694 = vmatpush.msra.mxu2 %v37_v48 }
 0x7c4   :  { %v608_v51 = vpop.f32.mrf.mxu3 }
 0x7c5   :  { %v612_v52 = vadd.f32 %v608_v51, %v481_v50 }
 0x7c7   :  { %v614_v54 = vadd.f32 %v612_v52, %v1854_v6  ;;  %v625_v6 = vadd.f32 %v1693_v44, %v624_v57 }
 0x7c9   :  { %v618_v55 = vsel %vm58_vm0, %v614_v54, 0.0  ;;  %v2022_v58 = vsel %vm626_vm3, %v1693_v44, %v625_v6 }
 0x7ca   :  { %619 = vadd.xlane.f32.xlu0 %v618_v55 }
 0x835   :  { %v617_v53 = vpop.xlane.xlu2 %616 }
 0x836   :  { %v628_v15 = vmul.f32 %v2022_v58, %v617_v53 }
 0x838   :  { %v630_v61 = vsub.f32 %v613_v46, %v628_v15 }
 0x83a   :  { %v632_v62 = vmul.f32 %v630_v61, %v630_v61 }
 0x83c   :  { %v634_v63 = vsel %vm58_vm0, %v632_v62, 0.0 }
 0x83d   :  { %635 = vadd.xlane.f32.xlu2 %v634_v63  ;;  %v620_v3 = vpop.xlane.xlu0 %619 }
 0x83e   :  { %v629_v4 = vmul.f32 %v2022_v58, %v620_v3  ;;  %v2116_v3 = vld [vmem:[%s2297_s3 + $0x8] sm:$0xff]  ;;  %s1487_s3 = sshll.u32 %s2301_s7, 4  ;;  %s1488_s3 = int_to_ptr.hbm [resolvable:$true] %s1487_s3 }
 0x840   :  { %v631_v7 = vsub.f32 %v614_v54, %v629_v4 }
 0x842   :  { %v633_v9 = vmul.f32 %v631_v7, %v631_v7 }
 0x844   :  { %v637_v0 = vsel %vm58_vm0, %v633_v9, 0.0 }
 0x845   :  { %638 = vadd.xlane.f32.xlu1 %v637_v0 }
 0x855   :  { %1626 = vrot.lane.b32.xlu2 %v2028_v1, %s1765_s15 }
 0x85d   :  { %719 = vrot.lane.b32.xlu2 %v2034_v13, %s1765_s15 }
 0x8b0   :  { %v636_v2 = vpop.xlane.xlu2 %635 }
 0x8b1   :  { %v640_v10 = vmul.f32 %v636_v2, %v2022_v58 }
 0x8b3   :  { %v642_v34 = vadd.f32 1e-05, %v640_v10 }
 0x8b5   :  { %1694 = vrsqrt.f32 %v642_v34  ;;  %vm650_vm5 = vweird.f32 %v642_v34 }
 0x8b8   :  { %v1627_v14 = vpop.permute.xlu2 %1626  ;;  %v639_v11 = vpop.xlane.xlu1 %638 }
 0x8b9   :  { %v1629_v16 = vunpack.i.h.bf16 %v1627_v14  ;;  %v1628_v17 = vunpack.i.l.bf16 %v1627_v14  ;;  %v641_v18 = vmul.f32 %v639_v11, %v2022_v58 }
 0x8bb   :  { %v1695_v20 = vpop.eup %1694  ;;  %v643_v21 = vadd.f32 1e-05, %v641_v18  ;;  %745 = vmatpush.msrb.mxu0 %v1628_v17 }
 0x8bc   :  { %v645_v23 = vmul.f32 %v1695_v20, %v642_v34  ;;  %vm651_vm4 = vweird.f32 %v1695_v20 }
 0x8bd   :  { %1696 = vrsqrt.f32 %v643_v21  ;;  %746 = vmatpush.msrb.mxu0 %v1629_v16  ;;  %vm652_vm6 = vmor %vm650_vm5, %vm651_vm4  ;;  %vm660_vm8 = vweird.f32 %v643_v21 }
 0x8be   :  { %v646_v24 = vmul.f32 %v1695_v20, %v645_v23  ;;  %1535 = vmatmul.msk.f32.vlgmr.msrb.gmra.mxu0 %vm58_vm0, %v31_v22 }
 0x8c0   :  { %v647_v25 = vmul.f32 0.5, %v646_v24  ;;  %v720_v52 = vpop.permute.xlu2 %719 }
 0x8c2   :  { %v648_v26 = vsub.f32 1.5, %v647_v25 }
 0x8c3   :  { %v1697_v27 = vpop.eup %1696 }
 0x8c4   :  { %v649_v28 = vmul.f32 %v1695_v20, %v648_v26  ;;  %v655_v29 = vmul.f32 %v1697_v27, %v643_v21  ;;  %vm661_vm7 = vweird.f32 %v1697_v27 }
 0x8c5   :  { %vm662_vm9 = vmor %vm660_vm8, %vm661_vm7 }
 0x8c6   :  { %v653_v31 = vsel %vm652_vm6, %v1695_v20, %v649_v28  ;;  %v656_v32 = vmul.f32 %v1697_v27, %v655_v29  ;;  %1536 = vmatmul.msk.f32.gmra.mxu0 %vm58_vm0, %v32_v12 }
 0x8c7   :  { %v664_v37 = vmul.f32 %v653_v31, %v630_v61 }
 0x8c8   :  { %v657_v39 = vmul.f32 0.5, %v656_v32 }
 0x8c9   :  { %v667_v40 = vmul.f32 %v2047_v30, %v664_v37 }
 0x8ca   :  { %v658_v41 = vsub.f32 1.5, %v657_v39 }
 0x8cb   :  { %v2055_v42 = vadd.f32 %v2051_v38, %v667_v40 }
 0x8cc   :  { %v659_v46 = vmul.f32 %v1697_v27, %v658_v41 }
 0x8cd   :  { %1533 = vmatmul.msk.f32.vlgmr.msra.gmra.mxu2 %vm58_vm0, %v2055_v42 }
 0x8ce   :  { %v663_v8 = vsel %vm662_vm9, %v1697_v27, %v659_v46  ;;  %1537 = vmatmul.msk.f32.gmra.mxu0 %vm58_vm0, %v33_v43 }
 0x8cf   :  { %v665_v47 = vmul.f32 %v663_v8, %v631_v7 }
 0x8d1   :  { %v668_v49 = vmul.f32 %v2047_v30, %v665_v47 }
 0x8d3   :  { %v2065_v50 = vadd.f32 %v2051_v38, %v668_v49 }
 0x8d5   :  { %1534 = vmatmul.msk.f32.gmra.mxu2 %vm58_vm0, %v2065_v50 }
 0x93b   :  { %v748_v51 = vpop.f32.mrf.mxu0 }
 0x93c   :  { %v2086_v56 = vadd.f32 %v748_v51, %v720_v52 }
 0x943   :  { %v751_v54 = vpop.f32.mrf.mxu0 }
 0x944   :  { %v2069_v55 = vadd.f32 %v751_v54, %v720_v52 }
 0x946   :  { %897 = vrot.lane.b32.xlu0 %v2069_v55, %s1767_s20 }
 0x94b   :  { %v754_v33 = vpop.f32.mrf.mxu0 }
 0x94c   :  { %v2073_v44 = vadd.f32 %v754_v33, %v720_v52 }
 0x94e   :  { %899 = vrot.lane.b32.xlu2 %v2073_v44, %s1767_s20  ;;  %1538 = vmatpush.xpose.msk.msrb.mxu1 %vm95_vm1, %v2073_v44  ;;  %v2128_v26 = vpack.i.bf16 %v2069_v55, %v2073_v44 }
 0x950   :  { %v696_v45 = vpop.f32.mrf.mxu2 }
 0x951   :  { %v2080_v5 = vadd.f32 %v696_v45, %v2034_v13 }
 0x952   :  { %1539 = vmatpush.xpose.msk.msrb.mxu1 %vm95_vm1, %v2069_v55 }
 0x953   :  { %891 = vrot.lane.b32.xlu1 %v2080_v5, %s1767_s20 }
 0x956   :  { %895 = vrot.lane.b32.xlu2 %v2086_v56, %s1767_s20  ;;  %1540 = vmatpush.xpose.msk.msrb.mxu1 %vm95_vm1, %v2086_v56 }
 0x958   :  { %v699_v48 = vpop.f32.mrf.mxu2 }
 0x959   :  { %1541 = vmatmul.msk.f32.vlgmr.msrb.gmra.mxu1 %vm95_vm1, %v2080_v5  ;;  %v2095_v57 = vadd.f32 %v699_v48, %v2034_v13 }
 0x95e   :  { %893 = vrot.lane.b32.xlu2 %v2095_v57, %s1767_s20 }
 0x961   :  { %1542 = vmatmul.msk.f32.gmra.mxu1 %vm95_vm1, %v2095_v57 }
 0x9a8   :  { %v900_v6 = vpop.permute.xlu2 %899 }
 0x9a9   :  { %1547 = vmatpush.xpose.msk.msra.mxu1 %vm95_vm1, %v900_v6 }
 0x9b0   :  { %v896_v59 = vpop.permute.xlu2 %895 }
 0x9b8   :  { %v898_v53 = vpop.permute.xlu0 %897  ;;  %v894_v19 = vpop.permute.xlu2 %893 }
 0x9b9   :  { %1548 = vmatpush.xpose.msk.msra.mxu1 %vm95_vm1, %v898_v53 }
 0x9bd   :  { %1549 = vmatpush.xpose.msk.msra.mxu1 %vm95_vm1, %v896_v59 }
 0x9c5   :  { %v892_v15 = vpop.permute.xlu1 %891 }
 0x9c6   :  { %1550 = vmatmul.msk.f32.vlgmr.msra.gmra.mxu1 %vm95_vm1, %v892_v15 }
 0x9ce   :  { %1551 = vmatmul.msk.f32.gmra.mxu1 %vm95_vm1, %v894_v19 }
 0x9d6   :  { %v790_v61 = vpop.f32.mrf.mxu1 }
 0x9d7   :  { %v791_v62 = vadd.f32 %v790_v61, %v2109_v60 }
 0x9d9   :  { %v797_v63 = vsel %vm796_vm10, %v791_v62, -inf }
 0x9da   :  { %798 = vmax.xlane.f32.xlu0 %v797_v63 }
 0x9de   :  { %v793_v4 = vpop.f32.mrf.mxu1 }
 0x9df   :  { %v794_v7 = vadd.f32 %v793_v4, %v2116_v3 }
 0x9e1   :  { %v800_v9 = vsel %vm796_vm10, %v794_v7, -inf }
 0x9e2   :  { %801 = vmax.xlane.f32.xlu1 %v800_v9 }
 0xa43   :  { %v928_v0 = vpop.f32.mrf.mxu1 }
 0xa44   :  { %v929_v2 = vadd.f32 %v928_v0, %v2109_v60 }
 0xa46   :  { %v934_v10 = vsel %vm796_vm10, %v929_v2, -inf }
 0xa47   :  { %935 = vmax.xlane.f32.xlu2 %v934_v10 }
 0xa4b   :  { %v931_v34 = vpop.f32.mrf.mxu1 }
 0xa4c   :  { %v932_v13 = vadd.f32 %v931_v34, %v2116_v3 }
 0xa4d   :  { %v799_v14 = vpop.xlane.xlu0 %798 }
 0xa4e   :  { %v803_v11 = vsub.f32 %v791_v62, %v799_v14  ;;  %v937_v16 = vsel %vm796_vm10, %v932_v13, -inf }
 0xa4f   :  { %938 = vmax.xlane.f32.xlu0 %v937_v16 }
 0xa50   :  { %v805_v17 = vmul.f32 1.442695, %v803_v11 }
 0xa52   :  { %1698 = vpow2.f32 %v805_v17 }
 0xa55   :  { %v802_v18 = vpop.xlane.xlu1 %801 }
 0xa56   :  { %v804_v20 = vsub.f32 %v794_v7, %v802_v18 }
 0xa58   :  { %v1699_v21 = vpop.eup %1698  ;;  %v807_v22 = vmul.f32 1.442695, %v804_v20 }
 0xa59   :  { %v809_v23 = vsel %vm796_vm10, %v1699_v21, 0.0 }
 0xa5a   :  { %1700 = vpow2.f32 %v807_v22  ;;  %810 = vadd.xlane.f32.xlu2 %v809_v23 }
 0xa60   :  { %v1701_v24 = vpop.eup %1700 }
 0xa61   :  { %v812_v25 = vsel %vm796_vm10, %v1701_v24, 0.0 }
 0xa62   :  { %813 = vadd.xlane.f32.xlu1 %v812_v25  ;;  %v2185_v25 = vld [vmem:[%s2300_s6] sm:$0xff]  ;;  %s1780_s6 = smov 8  }
 0xa63   :  { %1636 = vrot.lane.b32.xlu0 %v2128_v26, %s1770_s22 }
 0xa72   :  { %1631 = vrot.lane.b32.xlu2 %v2128_v26, %s1765_s15 }
 0xa7b   :  { %819 = vrot.lane.b32.xlu1 %v2086_v56, %s1765_s15 }
 0xa83   :  { %1173 = vrot.lane.b32.xlu1 %v2073_v44, %s1774_s26 }
 0xa8b   :  { %1171 = vrot.lane.b32.xlu1 %v2069_v55, %s1774_s26 }
 0xa93   :  { %1169 = vrot.lane.b32.xlu1 %v2086_v56, %s1774_s26 }
 0xa9b   :  { %1028 = vrot.lane.b32.xlu1 %v2080_v5, %s1772_s24 }
 0xaa3   :  { %1030 = vrot.lane.b32.xlu1 %v2095_v57, %s1772_s24 }
 0xaba   :  { %v936_v27 = vpop.xlane.xlu2 %935 }
 0xabb   :  { %v940_v12 = vsub.f32 %v929_v2, %v936_v27  ;;  %v757_v27 = vperm.slane %v2185_v25, 3 }
 0xabd   :  { %v942_v28 = vmul.f32 1.442695, %v940_v12 }
 0xabf   :  { %1702 = vpow2.f32 %v942_v28 }
 0xac2   :  { %v939_v29 = vpop.xlane.xlu0 %938 }
 0xac3   :  { %v941_v31 = vsub.f32 %v932_v13, %v939_v29 }
 0xac5   :  { %v1703_v32 = vpop.eup %1702  ;;  %v944_v37 = vmul.f32 1.442695, %v941_v31 }
 0xac6   :  { %v946_v39 = vsel %vm796_vm10, %v1703_v32, 0.0 }
 0xac7   :  { %1704 = vpow2.f32 %v944_v37  ;;  %947 = vadd.xlane.f32.xlu0 %v946_v39 }
 0xacd   :  { %v1705_v40 = vpop.eup %1704  ;;  %v811_v41 = vpop.xlane.xlu2 %810 }
 0xace   :  { %v949_v43 = vsel %vm796_vm10, %v1705_v40, 0.0  ;;  %1706 = vrcp.f32 %v811_v41 }
 0xacf   :  { %950 = vadd.xlane.f32.xlu2 %v949_v43 }
 0xad4   :  { %v1707_v33 = vpop.eup %1706 }
 0xad5   :  { %v1632_v46 = vpop.permute.xlu2 %1631  ;;  %v1637_v47 = vpop.permute.xlu0 %1636  ;;  %v817_v45 = vmul.f32 %v1707_v33, %v1699_v21 }
 0xad6   :  { %v1633_v8 = vunpack.i.l.bf16 %v1632_v46  ;;  %v1638_v49 = vunpack.i.l.bf16 %v1637_v47  ;;  %v1634_v51 = vunpack.i.h.bf16 %v1632_v46  ;;  %v1639_v52 = vunpack.i.h.bf16 %v1637_v47  ;;  %v814_v54 = vpop.xlane.xlu1 %813 }
 0xad7   :  { %1708 = vrcp.f32 %v814_v54 }
 0xad8   :  { %847 = vmatpush.msra.mxu3 %v1633_v8  ;;  %984 = vmatpush.msra.mxu0 %v1638_v49 }
 0xada   :  { %848 = vmatpush.msra.mxu3 %v1634_v51  ;;  %985 = vmatpush.msra.mxu0 %v1639_v52 }
 0xadb   :  { %956 = vrot.lane.b32.xlu0 %v2086_v56, %s1770_s22  ;;  %s1779_s22 = smov 128  }
 0xadd   :  { %v1709_v6 = vpop.eup %1708 }
 0xae3   :  { %1641 = vrot.lane.b32.xlu0 %v2028_v1, %s1766_s19  ;;  %v818_v1 = vmul.f32 %v1709_v6, %v1701_v24 }
 0xae7   :  { %1032 = vrot.lane.b32.xlu2 %v2086_v56, %s1772_s24 }
 0xaeb   :  { %1036 = vrot.lane.b32.xlu0 %v2073_v44, %s1772_s24 }
 0xaed   :  { %v820_v48 = vpop.permute.xlu1 %819 }
 0xaee   :  { %849 = vmatpush.msra.mxu3 %v820_v48 }
 0xaef   :  { %1543 = vmatmul.msk.f32.vlgmr.msra.gmra.mxu3 %vm796_vm10, %v817_v45 }
 0xaf3   :  { %1034 = vrot.lane.b32.xlu0 %v2069_v55, %s1772_s24 }
 0xaf5   :  { %v1174_v15 = vpop.permute.xlu1 %1173 }
 0xaf7   :  { %1544 = vmatmul.msk.f32.gmra.mxu3 %vm796_vm10, %v818_v1 }
 0xafb   :  { %1165 = vrot.lane.b32.xlu0 %v2080_v5, %s1774_s26 }
 0xafd   :  { %v1172_v4 = vpop.permute.xlu1 %1171 }
 0xb03   :  { %1167 = vrot.lane.b32.xlu0 %v2095_v57, %s1774_s26 }
 0xb05   :  { %v1170_v9 = vpop.permute.xlu1 %1169 }
 0xb0d   :  { %v1029_v13 = vpop.permute.xlu1 %1028 }
 0xb15   :  { %v1031_v14 = vpop.permute.xlu1 %1030 }
 0xb3a   :  { %v948_v44 = vpop.xlane.xlu0 %947 }
 0xb3b   :  { %1710 = vrcp.f32 %v948_v44 }
 0xb41   :  { %v1711_v59 = vpop.eup %1710 }
 0xb42   :  { %v951_v53 = vpop.xlane.xlu2 %950  ;;  %v954_v19 = vmul.f32 %v1711_v59, %v1703_v32 }
 0xb43   :  { %1712 = vrcp.f32 %v951_v53 }
 0xb49   :  { %v1713_v55 = vpop.eup %1712 }
 0xb4a   :  { %v955_v63 = vmul.f32 %v1713_v55, %v1705_v40  ;;  %v1033_v2 = vpop.permute.xlu2 %1032 }
 0xb4d   :  { %v957_v61 = vpop.permute.xlu0 %956 }
 0xb4e   :  { %986 = vmatpush.msra.mxu0 %v957_v61 }
 0xb4f   :  { %1552 = vmatmul.msk.f32.vlgmr.msra.gmra.mxu0 %vm796_vm10, %v954_v19 }
 0xb55   :  { %v1642_v62 = vpop.permute.xlu0 %1641 }
 0xb56   :  { %v1644_v7 = vunpack.i.h.bf16 %v1642_v62  ;;  %v1643_v5 = vunpack.i.l.bf16 %v1642_v62 }
 0xb57   :  { %1553 = vmatmul.msk.f32.gmra.mxu0 %vm796_vm10, %v955_v63 }
 0xb58   :  { %1018 = vmatpush.msrb.mxu3 %v1643_v5  ;;  %881 = vmatpush.msrb.mxu2 %v1644_v7 }
 0xb5a   :  { %1565 = vmatpush.xpose.msk.msra.mxu3 %vm95_vm1, %v1174_v15 }
 0xb5d   :  { %v1037_v57 = vpop.permute.xlu0 %1036 }
 0xb5e   :  { %1566 = vmatpush.xpose.msk.msra.mxu3 %vm95_vm1, %v1172_v4  ;;  %1556 = vmatpush.xpose.msk.msra.mxu2 %vm95_vm1, %v1037_v57 }
 0xb62   :  { %1567 = vmatpush.xpose.msk.msra.mxu3 %vm95_vm1, %v1170_v9 }
 0xb65   :  { %v1035_v0 = vpop.permute.xlu0 %1034 }
 0xb66   :  { %1557 = vmatpush.xpose.msk.msra.mxu2 %vm95_vm1, %v1035_v0 }
 0xb6a   :  { %1558 = vmatpush.xpose.msk.msra.mxu2 %vm95_vm1, %v1033_v2 }
 0xb6d   :  { %v1166_v17 = vpop.permute.xlu0 %1165 }
 0xb72   :  { %v851_v10 = vpop.f32.mrf.mxu3 }
 0xb73   :  { %1545 = vmatmul.msk.f32.vlgmr.msrb.gmra.mxu2 %vm95_vm1, %v851_v10 }
 0xb75   :  { %v1168_v18 = vpop.permute.xlu0 %1167 }
 0xb7a   :  { %v854_v34 = vpop.f32.mrf.mxu3 }
 0xb7b   :  { %1546 = vmatmul.msk.f32.gmra.mxu2 %vm95_vm1, %v854_v34  ;;  %v1655_v34 = vpack.i.bf16 %v2000_v36, %v1995_v35 }
 0xb83   :  { %1559 = vmatmul.msk.f32.vlgmr.msra.gmra.mxu2 %vm95_vm1, %v1029_v13 }
 0xb8b   :  { %1560 = vmatmul.msk.f32.gmra.mxu2 %vm95_vm1, %v1031_v14 }
 0xbcc   :  { %v988_v11 = vpop.f32.mrf.mxu0 }
 0xbcd   :  { %1554 = vmatmul.msk.f32.vlgmr.msrb.gmra.mxu3 %vm95_vm1, %v988_v11 }
 0xbd4   :  { %v991_v16 = vpop.f32.mrf.mxu0 }
 0xbd5   :  { %1555 = vmatmul.msk.f32.gmra.mxu3 %vm95_vm1, %v991_v16 }
 0xbdd   :  { %1568 = vmatmul.msk.f32.vlgmr.msra.gmra.mxu3 %vm95_vm1, %v1166_v17 }
 0xbe5   :  { %1569 = vmatmul.msk.f32.gmra.mxu3 %vm95_vm1, %v1168_v18 }
 0xbf6   :  { %v883_v20 = vpop.f32.mrf.mxu2 }
 0xbf7   :  { %v889_v12 = vadd.f32 %v883_v20, %v757_v27 }
 0xbfe   :  { %v886_v21 = vpop.f32.mrf.mxu2 }
 0xbff   :  { %v890_v31 = vadd.f32 %v886_v21, %v757_v27 }
 0xc06   :  { %v1065_v22 = vpop.f32.mrf.mxu2 }
 0xc07   :  { %v1066_v23 = vadd.f32 %v1065_v22, %v2109_v60 }
 0xc09   :  { %v1071_v24 = vsel %vm796_vm10, %v1066_v23, -inf }
 0xc0a   :  { %1072 = vmax.xlane.f32.xlu1 %v1071_v24 }
 0xc0e   :  { %v1068_v43 = vpop.f32.mrf.mxu2 }
 0xc0f   :  { %v1069_v46 = vadd.f32 %v1068_v43, %v2116_v3 }
 0xc11   :  { %v1074_v51 = vsel %vm796_vm10, %v1069_v46, -inf }
 0xc50   :  { %v1020_v28 = vpop.f32.mrf.mxu3 }
 0xc51   :  { %v2188_v29 = vadd.f32 %v1020_v28, %v889_v12 }
 0xc58   :  { %v1023_v32 = vpop.f32.mrf.mxu3 }
 0xc59   :  { %v2190_v37 = vadd.f32 %v1023_v32, %v890_v31 }
 0xc60   :  { %v1202_v39 = vpop.f32.mrf.mxu3 }
 0xc61   :  { %v1203_v40 = vadd.f32 %v1202_v39, %v2109_v60 }
 0xc63   :  { %v1208_v41 = vsel %vm796_vm10, %v1203_v40, -inf }
 0xc64   :  { %1209 = vmax.xlane.f32.xlu0 %v1208_v41 }
 0xc68   :  { %v1205_v8 = vpop.f32.mrf.mxu3 }
 0xc69   :  { %v1206_v47 = vadd.f32 %v1205_v8, %v2116_v3 }
 0xc6b   :  { %v1211_v49 = vsel %vm796_vm10, %v1206_v47, -inf }
 0xc6c   :  { %1212 = vmax.xlane.f32.xlu2 %v1211_v49  ;;  %1075 = vmax.xlane.f32.xlu0 %v1074_v51 }
 0xc7d   :  { %v1073_v60 = vpop.xlane.xlu1 %1072 }
 0xc7e   :  { %v1077_v52 = vsub.f32 %v1066_v23, %v1073_v60 }
 0xc80   :  { %1651 = vrot.lane.b32.xlu0 %v2128_v26, %s1771_s23  ;;  %v1079_v54 = vmul.f32 1.442695, %v1077_v52 }
 0xc82   :  { %1714 = vpow2.f32 %v1079_v54 }
 0xc84   :  { %1646 = vrot.lane.b32.xlu2 %v2128_v26, %s1773_s25 }
 0xc88   :  { %v1715_v3 = vpop.eup %1714 }
 0xc89   :  { %v1083_v33 = vsel %vm796_vm10, %v1715_v3, 0.0 }
 0xc8c   :  { %1093 = vrot.lane.b32.xlu2 %v2086_v56, %s1771_s23 }
 0xc94   :  { %1656 = vrot.lane.b32.xlu2 %v1655_v34, %s1766_s19 }
 0xcaa   :  { %1084 = vadd.xlane.f32.xlu0 %v1083_v33 }
 0xcd7   :  { %v1210_v45 = vpop.xlane.xlu0 %1209 }
 0xcd8   :  { %v1214_v48 = vsub.f32 %v1203_v40, %v1210_v45 }
 0xcda   :  { %v1216_v6 = vmul.f32 1.442695, %v1214_v48 }
 0xcdc   :  { %1716 = vpow2.f32 %v1216_v6 }
 0xcdf   :  { %v1213_v1 = vpop.xlane.xlu2 %1212  ;;  %v1076_v44 = vpop.xlane.xlu0 %1075 }
 0xce0   :  { %v1215_v53 = vsub.f32 %v1206_v47, %v1213_v1  ;;  %v1078_v59 = vsub.f32 %v1069_v46, %v1076_v44 }
 0xce2   :  { %v1717_v26 = vpop.eup %1716  ;;  %v1218_v15 = vmul.f32 1.442695, %v1215_v53  ;;  %v1081_v19 = vmul.f32 1.442695, %v1078_v59  ;;  %v46_v53 = vld [vmem:[%s2299_s5 + $0x10] sm:$0xff]  ;;  %v45_v59 = vld [vmem:[%s2299_s5 + $0x8] sm:$0xff] }
 0xce3   :  { %v1220_v61 = vsel %vm796_vm10, %v1717_v26, 0.0 }
 0xce4   :  { %1718 = vpow2.f32 %v1218_v15  ;;  %1221 = vadd.xlane.f32.xlu1 %v1220_v61 }
 0xce5   :  { %1720 = vpow2.f32 %v1081_v19 }
 0xce7   :  { %v1647_v55 = vpop.permute.xlu2 %1646 }
 0xce8   :  { %v1648_v62 = vunpack.i.l.bf16 %v1647_v55  ;;  %v1649_v4 = vunpack.i.h.bf16 %v1647_v55  ;;  %v55_v55 = vld [vmem:[%s2299_s5 + $0x58] sm:$0xff] }
 0xce9   :  { %1408 = vmatpush.msrb.mxu3 %v55_v55 }
 0xcea   :  { %v1719_v63 = vpop.eup %1718  ;;  %1258 = vmatpush.msrb.mxu2 %v1648_v62  ;;  %v54_v62 = vld [vmem:[%s2299_s5 + $0x50] sm:$0xff] }
 0xceb   :  { %v1721_v7 = vpop.eup %1720  ;;  %v1223_v5 = vsel %vm796_vm10, %v1719_v63, 0.0  ;;  %1409 = vmatpush.msrb.mxu3 %v54_v62 }
 0xcec   :  { %1259 = vmatpush.msrb.mxu2 %v1649_v4  ;;  %1224 = vadd.xlane.f32.xlu1 %v1223_v5  ;;  %v1086_v57 = vsel %vm796_vm10, %v1721_v7, 0.0  ;;  %v53_v4 = vld [vmem:[%s2299_s5 + $0x48] sm:$0xff]  ;;  %v52_v5 = vld [vmem:[%s2299_s5 + $0x40] sm:$0xff] }
 0xced   :  { %1087 = vadd.xlane.f32.xlu0 %v1086_v57  ;;  %1410 = vmatpush.msrb.mxu3 %v53_v4 }
 0xcef   :  { %v1094_v10 = vpop.permute.xlu2 %1093  ;;  %1411 = vmatpush.msrb.mxu3 %v52_v5 }
 0xcf2   :  { %v1652_v9 = vpop.permute.xlu0 %1651 }
 0xcf3   :  { %v1653_v0 = vunpack.i.l.bf16 %v1652_v9  ;;  %v1654_v2 = vunpack.i.h.bf16 %v1652_v9 }
 0xcf5   :  { %1121 = vmatpush.msrb.mxu1 %v1653_v0 }
 0xcf7   :  { %1122 = vmatpush.msrb.mxu1 %v1654_v2  ;;  %v1657_v17 = vpop.permute.xlu2 %1656  ;;  %v51_v2 = vld [vmem:[%s2299_s5 + $0x38] sm:$0xff] }
 0xcf8   :  { %v1659_v18 = vunpack.i.h.bf16 %v1657_v17  ;;  %v1658_v20 = vunpack.i.l.bf16 %v1657_v17  ;;  %1412 = vmatpush.msrb.mxu3 %v51_v2 }
 0xcf9   :  { %1123 = vmatpush.msrb.mxu1 %v1094_v10 }
 0xcfa   :  { %1155 = vmatpush.msrb.mxu0 %v1658_v20 }
 0xcfb   :  { %1292 = vmatpush.msra.mxu1 %v1659_v18 }
 0xd05   :  { %1230 = vrot.lane.b32.xlu1 %v2086_v56, %s1773_s25 }
 0xd1d   :  { %v1085_v13 = vpop.xlane.xlu0 %1084 }
 0xd1e   :  { %1722 = vrcp.f32 %v1085_v13 }
 0xd24   :  { %v1723_v14 = vpop.eup %1722 }
 0xd25   :  { %v1091_v11 = vmul.f32 %v1723_v14, %v1715_v3 }
 0xd27   :  { %1561 = vmatmul.msk.f32.vlgmr.msrb.gmra.mxu1 %vm796_vm10, %v1091_v11 }
 0xd57   :  { %v1222_v21 = vpop.xlane.xlu1 %1221 }
 0xd5f   :  { %v1225_v35 = vpop.xlane.xlu1 %1224 }
 0xd60   :  { %v1088_v16 = vpop.xlane.xlu0 %1087 }
 0xd61   :  { %1724 = vrcp.f32 %v1088_v16 }
 0xd62   :  { %1726 = vrcp.f32 %v1222_v21 }
 0xd63   :  { %1728 = vrcp.f32 %v1225_v35 }
 0xd67   :  { %v1725_v56 = vpop.eup %1724 }
 0xd68   :  { %v1092_v22 = vmul.f32 %v1725_v56, %v1721_v7  ;;  %v1727_v36 = vpop.eup %1726 }
 0xd69   :  { %v1228_v23 = vmul.f32 %v1727_v36, %v1717_v26  ;;  %v1729_v27 = vpop.eup %1728  ;;  %v44_v26 = vld [vmem:[%s2299_s5] sm:$0xff] }
 0xd6a   :  { %1562 = vmatmul.msk.f32.gmra.mxu1 %vm796_vm10, %v1092_v22  ;;  %v1229_v12 = vmul.f32 %v1729_v27, %v1719_v63 }
 0xd77   :  { %v1231_v24 = vpop.permute.xlu1 %1230 }
 0xd78   :  { %1260 = vmatpush.msrb.mxu2 %v1231_v24 }
 0xd79   :  { %1570 = vmatmul.msk.f32.vlgmr.msrb.gmra.mxu2 %vm796_vm10, %v1228_v23 }
 0xd81   :  { %1571 = vmatmul.msk.f32.gmra.mxu2 %vm796_vm10, %v1229_v12 }
 0xda4   :  { %v1125_v28 = vpop.f32.mrf.mxu1 }
 0xda5   :  { %1563 = vmatmul.msk.f32.vlgmr.msrb.gmra.mxu0 %vm95_vm1, %v1125_v28 }
 0xde7   :  { %v1128_v31 = vpop.f32.mrf.mxu1 }
 0xde8   :  { %1564 = vmatmul.msk.f32.gmra.mxu0 %vm95_vm1, %v1128_v31 }
 0xdfc   :  { %v1262_v32 = vpop.f32.mrf.mxu2 }
 0xdfd   :  { %1572 = vmatmul.msk.f32.vlgmr.msra.gmra.mxu1 %vm95_vm1, %v1262_v32  ;;  %v50_v32 = vld [vmem:[%s2299_s5 + $0x30] sm:$0xff] }
 0xdfe   :  { %1413 = vmatpush.msrb.mxu3 %v50_v32 }
 0xe04   :  { %v1265_v39 = vpop.f32.mrf.mxu2 }
 0xe05   :  { %1573 = vmatmul.msk.f32.gmra.mxu1 %vm95_vm1, %v1265_v39  ;;  %v49_v39 = vld [vmem:[%s2299_s5 + $0x28] sm:$0xff] }
 0xe06   :  { %1414 = vmatpush.msrb.mxu3 %v49_v39 }
 0xe22   :  { %v1157_v40 = vpop.f32.mrf.mxu0 }
 0xe23   :  { %v1163_v41 = vadd.f32 %v1157_v40, %v2188_v29  ;;  %v48_v40 = vld [vmem:[%s2299_s5 + $0x20] sm:$0xff] }
 0xe24   :  { %1415 = vmatpush.msrb.mxu3 %v48_v40 }
 0xe65   :  { %v1160_v47 = vpop.f32.mrf.mxu0 }
 0xe66   :  { %v1164_v51 = vadd.f32 %v1160_v47, %v2190_v37 }
 0xe7a   :  { %v1294_v43 = vpop.f32.mrf.mxu1 }
 0xe7b   :  { %v1300_v46 = vadd.f32 %v1294_v43, %v1163_v41  ;;  %v1360_v41 = vperm.slane %v2185_v25, 4 }
 0xe7d   :  { %v1302_v8 = vadd.f32 %v1300_v46, %v2055_v42 }
 0xe7f   :  { %v1304_v49 = vsel %vm58_vm0, %v1302_v8, 0.0 }
 0xe80   :  { %1305 = vadd.xlane.f32.xlu1 %v1304_v49 }
 0xe82   :  { %v1297_v60 = vpop.f32.mrf.mxu1 }
 0xe83   :  { %v1301_v52 = vadd.f32 %v1297_v60, %v1164_v51  ;;  %v1392_v60 = vperm.slane %v2185_v25, 5 }
 0xe85   :  { %v1303_v54 = vadd.f32 %v1301_v52, %v2065_v50 }
 0xe87   :  { %v1307_v3 = vsel %vm58_vm0, %v1303_v54, 0.0 }
 0xe88   :  { %1308 = vadd.xlane.f32.xlu2 %v1307_v3 }
 0xe99   :  { %1349 = vrot.lane.b32.xlu1 %v2047_v30, %s1765_s15 }
 0xea1   :  { %1469 = vrot.lane.b32.xlu1 %v2047_v30, %s1768_s1  ;;  %v47_v30 = vld [vmem:[%s2299_s5 + $0x18] sm:$0xff]  ;;  %s1778_s5 = smov [#allocation2]  }
 0xea2   :  { %1379 = vmatpush.msra.mxu0 %v47_v30 }
 0xea4   :  { %1380 = vmatpush.msra.mxu0 %v46_v53 }
 0xea6   :  { %1381 = vmatpush.msra.mxu0 %v45_v59 }
 0xea8   :  { %1382 = vmatpush.msra.mxu0 %v44_v26 }
 0xef3   :  { %v1306_v42 = vpop.xlane.xlu1 %1305 }
 0xef4   :  { %v1310_v29 = vmul.f32 %v1306_v42, %v2022_v58 }
 0xef6   :  { %v1312_v33 = vsub.f32 %v1302_v8, %v1310_v29 }
 0xef8   :  { %v1314_v45 = vmul.f32 %v1312_v33, %v1312_v33 }
 0xefa   :  { %v1316_v37 = vsel %vm58_vm0, %v1314_v45, 0.0 }
 0xefb   :  { %1317 = vadd.xlane.f32.xlu0 %v1316_v37  ;;  %v1309_v48 = vpop.xlane.xlu2 %1308 }
 0xefc   :  { %v1311_v50 = vmul.f32 %v1309_v48, %v2022_v58 }
 0xefe   :  { %v1313_v6 = vsub.f32 %v1303_v54, %v1311_v50 }
 0xf00   :  { %v1315_v1 = vmul.f32 %v1313_v6, %v1313_v6 }
 0xf02   :  { %v1319_v44 = vsel %vm58_vm0, %v1315_v1, 0.0 }
 0xf03   :  { %1320 = vadd.xlane.f32.xlu0 %v1319_v44 }
 0xf0b   :  { %v1350_v20 = vpop.permute.xlu1 %1349 }
 0xf17   :  { %1355 = vrot.lane.b32.xlu0 %v2051_v38, %s1765_s15 }
 0xf6e   :  { %v1318_v15 = vpop.xlane.xlu0 %1317 }
 0xf6f   :  { %v1322_v19 = vmul.f32 %v1318_v15, %v2022_v58 }
 0xf71   :  { %v1324_v61 = vadd.f32 1e-05, %v1322_v19 }
 0xf73   :  { %1730 = vrsqrt.f32 %v1324_v61  ;;  %vm1332_vm12 = vweird.f32 %v1324_v61 }
 0xf76   :  { %v1321_v63 = vpop.xlane.xlu0 %1320 }
 0xf77   :  { %v1323_v7 = vmul.f32 %v1321_v63, %v2022_v58 }
 0xf79   :  { %v1731_v57 = vpop.eup %1730  ;;  %v1325_v9 = vadd.f32 1e-05, %v1323_v7 }
 0xf7a   :  { %v1327_v0 = vmul.f32 %v1731_v57, %v1324_v61  ;;  %vm1333_vm11 = vweird.f32 %v1731_v57 }
 0xf7b   :  { %1732 = vrsqrt.f32 %v1325_v9  ;;  %vm1334_vm13 = vmor %vm1332_vm12, %vm1333_vm11  ;;  %vm1342_vm15 = vweird.f32 %v1325_v9 }
 0xf7c   :  { %v1328_v10 = vmul.f32 %v1731_v57, %v1327_v0 }
 0xf7e   :  { %v1329_v34 = vmul.f32 0.5, %v1328_v10 }
 0xf80   :  { %v1330_v13 = vsub.f32 1.5, %v1329_v34  ;;  %v1470_v34 = vpop.permute.xlu1 %1469 }
 0xf81   :  { %v1733_v14 = vpop.eup %1732 }
 0xf82   :  { %v1337_v11 = vmul.f32 %v1733_v14, %v1325_v9  ;;  %v1331_v16 = vmul.f32 %v1731_v57, %v1330_v13  ;;  %vm1343_vm14 = vweird.f32 %v1733_v14 }
 0xf83   :  { %vm1344_vm1 = vmor %vm1342_vm15, %vm1343_vm14 }
 0xf84   :  { %v1338_v17 = vmul.f32 %v1733_v14, %v1337_v11  ;;  %v1335_v18 = vsel %vm1334_vm13, %v1731_v57, %v1331_v16 }
 0xf85   :  { %v1346_v21 = vmul.f32 %v1335_v18, %v1312_v33 }
 0xf86   :  { %v1339_v56 = vmul.f32 0.5, %v1338_v17 }
 0xf87   :  { %v1352_v22 = vmul.f32 %v1350_v20, %v1346_v21 }
 0xf88   :  { %v1340_v35 = vsub.f32 1.5, %v1339_v56 }
 0xf89   :  { %v1356_v36 = vpop.permute.xlu0 %1355 }
 0xf8a   :  { %v1341_v23 = vmul.f32 %v1733_v14, %v1340_v35  ;;  %v1358_v24 = vadd.f32 %v1356_v36, %v1352_v22 }
 0xf8c   :  { %v1345_v27 = vsel %vm1344_vm1, %v1733_v14, %v1341_v23  ;;  %1574 = vmatmul.msk.f32.vlgmr.msra.gmra.mxu0 %vm58_vm0, %v1358_v24 }
 0xf8d   :  { %v1347_v12 = vmul.f32 %v1345_v27, %v1313_v6 }
 0xf8f   :  { %v1353_v28 = vmul.f32 %v1350_v20, %v1347_v12 }
 0xf91   :  { %v1359_v31 = vadd.f32 %v1356_v36, %v1353_v28 }
 0xf94   :  { %1575 = vmatmul.msk.f32.gmra.mxu0 %vm58_vm0, %v1359_v31 }
0x1009   :  { %v1384_v43 = vpop.f32.mrf.mxu0 }
0x100a   :  { %v1385_v46 = vadd.f32 %v1384_v43, %v1360_v41 }
0x100c   :  { %v1390_v8 = vmax.f32 %v1385_v46, 0.0 }
0x100e   :  { %1576 = vmatmul.msk.f32.vlgmr.msrb.gmra.mxu3 %vm1393_vm2, %v1390_v8 }
0x1011   :  { %v1387_v47 = vpop.f32.mrf.mxu0 }
0x1012   :  { %v1388_v49 = vadd.f32 %v1387_v47, %v1360_v41 }
0x1014   :  { %v1391_v51 = vmax.f32 %v1388_v49, 0.0 }
0x1016   :  { %1577 = vmatmul.msk.f32.gmra.mxu3 %vm1393_vm2, %v1391_v51 }
0x1091   :  { %v1417_v52 = vpop.f32.mrf.mxu3 }
0x1092   :  { %v1418_v54 = vadd.f32 %v1417_v52, %v1392_v60 }
0x1094   :  { %v1423_v3 = vadd.f32 %v1418_v54, %v1358_v24 }
0x1096   :  { %v1425_v42 = vsel %vm58_vm0, %v1423_v3, 0.0 }
0x1097   :  { %1426 = vadd.xlane.f32.xlu2 %v1425_v42 }
0x1099   :  { %v1420_v29 = vpop.f32.mrf.mxu3 }
0x109a   :  { %v1421_v33 = vadd.f32 %v1420_v29, %v1392_v60 }
0x109c   :  { %v1424_v45 = vadd.f32 %v1421_v33, %v1359_v31 }
0x109e   :  { %v1428_v37 = vsel %vm58_vm0, %v1424_v45, 0.0 }
0x109f   :  { %1429 = vadd.xlane.f32.xlu2 %v1428_v37 }
0x110a   :  { %v1427_v48 = vpop.xlane.xlu2 %1426 }
0x110b   :  { %v1431_v50 = vmul.f32 %v1427_v48, %v2022_v58 }
0x110d   :  { %v1433_v6 = vsub.f32 %v1423_v3, %v1431_v50 }
0x110f   :  { %v1435_v1 = vmul.f32 %v1433_v6, %v1433_v6 }
0x1111   :  { %v1437_v44 = vsel %vm58_vm0, %v1435_v1, 0.0 }
0x1112   :  { %1438 = vadd.xlane.f32.xlu2 %v1437_v44  ;;  %v1430_v25 = vpop.xlane.xlu2 %1429 }
0x1113   :  { %v1432_v30 = vmul.f32 %v1430_v25, %v2022_v58 }
0x1115   :  { %v1434_v53 = vsub.f32 %v1424_v45, %v1432_v30 }
0x1117   :  { %v1436_v59 = vmul.f32 %v1434_v53, %v1434_v53 }
0x1119   :  { %v1440_v26 = vsel %vm58_vm0, %v1436_v59, 0.0 }
0x111a   :  { %1441 = vadd.xlane.f32.xlu0 %v1440_v26 }
0x112a   :  { %1474 = vrot.lane.b32.xlu2 %v2051_v38, %s1768_s1  ;;  %s1485_s1 = sshll.u32 %s1778_s5, 4  ;;  %s1486_s1 = int_to_ptr.vmem [resolvable:$true] %s1485_s1 }
0x1185   :  { %v1439_v15 = vpop.xlane.xlu2 %1438 }
0x1186   :  { %v1443_v19 = vmul.f32 %v1439_v15, %v2022_v58 }
0x1188   :  { %v1445_v61 = vadd.f32 1e-05, %v1443_v19 }
0x118a   :  { %1734 = vrsqrt.f32 %v1445_v61  ;;  %vm1453_vm4 = vweird.f32 %v1445_v61 }
0x118d   :  { %v1442_v55 = vpop.xlane.xlu0 %1441  ;;  %v1475_v16 = vpop.permute.xlu2 %1474 }
0x118e   :  { %v1444_v62 = vmul.f32 %v1442_v55, %v2022_v58 }
0x1190   :  { %v1735_v63 = vpop.eup %1734  ;;  %v1446_v4 = vadd.f32 1e-05, %v1444_v62 }
0x1191   :  { %v1448_v7 = vmul.f32 %v1735_v63, %v1445_v61  ;;  %vm1454_vm3 = vweird.f32 %v1735_v63 }
0x1192   :  { %1736 = vrsqrt.f32 %v1446_v4  ;;  %vm1455_vm5 = vmor %vm1453_vm4, %vm1454_vm3  ;;  %vm1463_vm7 = vweird.f32 %v1446_v4 }
0x1193   :  { %v1449_v5 = vmul.f32 %v1735_v63, %v1448_v7 }
0x1195   :  { %v1450_v57 = vmul.f32 0.5, %v1449_v5 }
0x1197   :  { %v1451_v9 = vsub.f32 1.5, %v1450_v57 }
0x1198   :  { %v1737_v0 = vpop.eup %1736 }
0x1199   :  { %v1458_v2 = vmul.f32 %v1737_v0, %v1446_v4  ;;  %v1452_v38 = vmul.f32 %v1735_v63, %v1451_v9  ;;  %vm1464_vm6 = vweird.f32 %v1737_v0 }
0x119a   :  { %vm1465_vm8 = vmor %vm1463_vm7, %vm1464_vm6 }
0x119b   :  { %v1459_v10 = vmul.f32 %v1737_v0, %v1458_v2  ;;  %v1456_v13 = vsel %vm1455_vm5, %v1735_v63, %v1452_v38 }
0x119c   :  { %v1467_v14 = vmul.f32 %v1456_v13, %v1433_v6 }
0x119d   :  { %v1460_v11 = vmul.f32 0.5, %v1459_v10 }
0x119e   :  { %v1472_v58 = vmul.f32 %v1470_v34, %v1467_v14 }
0x119f   :  { %v1461_v17 = vsub.f32 1.5, %v1460_v11 }
0x11a0   :  { %v1477_v18 = vadd.f32 %v1475_v16, %v1472_v58 }
0x11a1   :  { %v1462_v20 = vmul.f32 %v1737_v0, %v1461_v17 }
0x11a2   :  { %1479 = vst.msk [vmem:[#allocation2] sm:$0xff] %vm58_vm0, %v1477_v18 }
0x11a3   :  { %v1466_v21 = vsel %vm1465_vm8, %v1737_v0, %v1462_v20 }
0x11a4   :  { %v1468_v56 = vmul.f32 %v1466_v21, %v1434_v53 }
0x11a6   :  { %v1473_v22 = vmul.f32 %v1470_v34, %v1468_v56 }
0x11a8   :  { %v1478_v35 = vadd.f32 %v1475_v16, %v1473_v22 }
0x11aa   :  { %1480 = vst.msk [vmem:[#allocation2 + $0x8] sm:$0xff] %vm58_vm0, %v1478_v35 }
0x11ab   :  { %1493 = dma.vmem_to_hbm [thread:$0]  %s1486_s1, 256, %s1488_s3, [#allocation3], %s1779_s22, %s1779_s22, %s1780_s6  }
0x11ac   :  { %1763 = dma.done.wait [#allocation3], 256  }
0x11ad   :  { %1764 = vsyncadd [#allocation3], 4294967040 }
0x11ae   :  { %1498 = vsyncpa [#allocation3], 1 }

</bundles_post_ra>
